<compile_context>
chip_gen: v7x
topology: tpu7x:2x2x1
jax: 0.10.0
libtpu: 0.0.40
codegen_flags: <defaults>
</compile_context>

<pallas_src>
import math
import functools

import jax
import jax.numpy as jnp
from jax import lax
from jax.experimental import pallas as pl
from jax.experimental.pallas import tpu as pltpu


# -----------------------------------------------------------------------------
# Helpers: generation-aware VMEM budget, tile selection with padding (never
# degrade to tiny tiles; pad the dim to a multiple of the chosen tile instead).
# -----------------------------------------------------------------------------
def _round_up(x, m):
    return ((x + m - 1) // m) * m


def _vmem_budget_bytes():
    """~5/8 of physical VMEM: ~40 MiB on v7x (64 MiB), ~80 MiB on v5e/v6e."""
    cap = 64 * 1024 * 1024
    try:
        info = pltpu.get_tpu_info()
        cap = int(getattr(info, "vmem_capacity_bytes", cap) or cap)
    except Exception:
        pass
    cap = min(cap, 128 * 1024 * 1024)
    return int(cap * 5 // 8)


_VMEM_LIMIT = _vmem_budget_bytes()


def _tile_and_pad(dim, target, align):
    """Return (tile, padded_dim).

    If dim <= target: a single full-dim block (exempt from the (8,128) rule).
    Otherwise: a tile that is a multiple of `align`, <= target, chosen to
    minimize padding; padded_dim is a multiple of the tile.
    """
    if dim <= target:
        return dim, dim
    n_blocks = pl.cdiv(dim, target)
    t = _round_up(pl.cdiv(dim, n_blocks), align)
    return t, _round_up(dim, t)


# -----------------------------------------------------------------------------
# Kernel 1: tiled dense (linear) layer   y = x @ W + b
#   x : (M, Din), W : (Din, Dout), b : (1, Dout)  ->  y : (M, Dout)
# Grid = (M/tm, Dout/tn, Din/tk); f32 VMEM accumulator; bias added and the
# output stored on the last K step.  Mixed dtypes (bf16 operands) are fine:
# accumulation is always f32 via preferred_element_type.
# -----------------------------------------------------------------------------
def _linear_kernel(x_ref, w_ref, b_ref, o_ref, acc_ref):
    @pl.when(pl.program_id(2) == 0)
    def _():
        acc_ref[...] = jnp.zeros_like(acc_ref)

    acc_ref[...] += jnp.dot(
        x_ref[...], w_ref[...], preferred_element_type=jnp.float32
    )

    @pl.when(pl.program_id(2) == pl.num_programs(2) - 1)
    def _():
        o_ref[...] = (acc_ref[...] + b_ref[...].astype(jnp.float32)).astype(
            o_ref.dtype
        )


def linear(x, w, b, *, out_dtype=None,
           tm_target=512, tn_target=512, tk_target=2048):
    """x: (M, Din); w: (Din, Dout); b: (Dout,)  ->  (M, Dout)"""
    M, Din = x.shape
    Dout = w.shape[1]
    out_dtype = out_dtype or x.dtype

    tm, Mp = _tile_and_pad(M, tm_target, 8)
    tn, Np = _tile_and_pad(Dout, tn_target, 128)
    tk, Kp = _tile_and_pad(Din, tk_target, 128)

    # Zero padding is mathematically inert for x @ W + b (extra K-rows add 0;
    # extra M rows / N cols are sliced off).  No-op when dims are aligned.
    if (Mp, Kp) != (M, Din):
        x = jnp.pad(x, ((0, Mp - M), (0, Kp - Din)))
    if (Kp, Np) != (Din, Dout):
        w = jnp.pad(w, ((0, Kp - Din), (0, Np - Dout)))
    b2 = b.reshape(1, Dout)
    if Np != Dout:
        b2 = jnp.pad(b2, ((0, 0), (0, Np - Dout)))

    out = pl.pallas_call(
        _linear_kernel,
        out_shape=jax.ShapeDtypeStruct((Mp, Np), out_dtype),
        grid=(Mp // tm, Np // tn, Kp // tk),
        in_specs=[
            pl.BlockSpec((tm, tk), lambda i, j, k: (i, k)),
            pl.BlockSpec((tk, tn), lambda i, j, k: (k, j)),
            pl.BlockSpec((1, tn), lambda i, j, k: (0, j)),
        ],
        out_specs=pl.BlockSpec((tm, tn), lambda i, j, k: (i, j)),
        scratch_shapes=[pltpu.VMEM((tm, tn), jnp.float32)],
        compiler_params=pltpu.CompilerParams(
            dimension_semantics=("parallel", "parallel", "arbitrary"),
            vmem_limit_bytes=_VMEM_LIMIT,
        ),
    )(x, w, b2)

    if (Mp, Np) != (M, Dout):
        out = out[:M, :Dout]
    return out


# -----------------------------------------------------------------------------
# Kernel 2: flash-style multi-head attention (merged-head layout)
#   q  : (B, Sq, H*hd)   kv : (B, Sk, 2*H*hd)  (K and V concatenated on lanes)
#   out: (B, Sq, H*hd)   -- single lane-dense store, no head transposes.
# Grid = (B, Sq/tq, Sk/tkv); KV is streamed block by block (online softmax),
# running m/l/acc live in VMEM scratch; heads are a short static loop.
# 1/sqrt(hd) is already folded into the query projection weights.
# -----------------------------------------------------------------------------
def _mha_flash_kernel(q_ref, kv_ref, o_ref, m_scr, l_scr, acc_scr, *,
                      num_heads, head_size, kv_len, kv_tile, mask_kv):
    j = pl.program_id(2)

    @pl.when(j == 0)
    def _():
        m_scr[...] = jnp.full_like(m_scr, -1e30)
        l_scr[...] = jnp.zeros_like(l_scr)
        acc_scr[...] = jnp.zeros_like(acc_scr)

    q_all = q_ref[0]                                   # (tq, H*hd)
    kv_all = kv_ref[0]                                 # (tkv, 2*H*hd)
    dq = num_heads * head_size
    tq = q_all.shape[0]

    if mask_kv:
        col = lax.broadcasted_iota(jnp.int32, (tq, kv_tile), 1) + j * kv_tile
        col_ok = col < kv_len

    # TODO(synk): when head_size is a multiple of 128, move heads onto a grid
    # axis (BlockSpec-level head selection) instead of in-kernel lane slices,
    # and verify via pl.lower_as_mlir that the score dot_general lowers to a
    # transposed-RHS MXU matmul (no per-head vxpose of the K tile).
    for h in range(num_heads):                         # static, small loop
        lo = h * head_size
        qh = q_all[:, lo:lo + head_size]               # (tq, hd)
        kh = kv_all[:, lo:lo + head_size]              # (tkv, hd)
        vh = kv_all[:, dq + lo:dq + lo + head_size]    # (tkv, hd)

        # scores: contract last dims directly (no explicit K transpose).
        s = lax.dot_general(
            qh, kh, (((1,), (1,)), ((), ())),
            preferred_element_type=jnp.float32,
        )                                              # (tq, tkv) f32
        if mask_kv:
            s = jnp.where(col_ok, s, -1e30)

        m_prev = m_scr[:, h:h + 1]                     # (tq, 1)
        l_prev = l_scr[:, h:h + 1]
        m_new = jnp.maximum(m_prev, jnp.max(s, axis=-1, keepdims=True))
        alpha = jnp.exp(m_prev - m_new)
        p = jnp.exp(s - m_new)

        l_scr[:, h:h + 1] = alpha * l_prev + jnp.sum(p, axis=-1, keepdims=True)
        pv = jnp.dot(p.astype(vh.dtype), vh,
                     preferred_element_type=jnp.float32)
        acc_scr[:, lo:lo + head_size] = (
            alpha * acc_scr[:, lo:lo + head_size] + pv
        )
        m_scr[:, h:h + 1] = m_new

    @pl.when(j == pl.num_programs(2) - 1)
    def _():
        inv = 1.0 / l_scr[...]                         # exact (tq, H)
        for h in range(num_heads):
            lo = h * head_size
            acc_scr[:, lo:lo + head_size] = (
                acc_scr[:, lo:lo + head_size] * inv[:, h:h + 1]
            )
        # single lane-dense store of the merged-head context
        o_ref[0] = acc_scr[...].astype(o_ref.dtype)


def multi_head_attention(q, kv, *, num_heads, head_size,
                         q_tile_target=256, kv_tile_target=512):
    """q: (B, Sq, H*hd); kv: (B, Sk, 2*H*hd)  ->  (B, Sq, H*hd)"""
    B, Sq, Dq = q.shape
    _, Sk, Dkv = kv.shape

    tq, Sq_pad = _tile_and_pad(Sq, q_tile_target, 8)
    tkv, Sk_pad = _tile_and_pad(Sk, kv_tile_target, 128)
    mask_kv = Sk_pad != Sk

    if Sq_pad != Sq:
        q = jnp.pad(q, ((0, 0), (0, Sq_pad - Sq), (0, 0)))
    if Sk_pad != Sk:
        kv = jnp.pad(kv, ((0, 0), (0, Sk_pad - Sk), (0, 0)))

    kern = functools.partial(
        _mha_flash_kernel,
        num_heads=num_heads, head_size=head_size,
        kv_len=Sk, kv_tile=tkv, mask_kv=mask_kv,
    )

    out = pl.pallas_call(
        kern,
        out_shape=jax.ShapeDtypeStruct((B, Sq_pad, Dq), q.dtype),
        grid=(B, Sq_pad // tq, Sk_pad // tkv),
        in_specs=[
            pl.BlockSpec((1, tq, Dq), lambda b, i, j: (b, i, 0)),
            pl.BlockSpec((1, tkv, Dkv), lambda b, i, j: (b, j, 0)),
        ],
        out_specs=pl.BlockSpec((1, tq, Dq), lambda b, i, j: (b, i, 0)),
        scratch_shapes=[
            pltpu.VMEM((tq, num_heads), jnp.float32),   # running max m
            pltpu.VMEM((tq, num_heads), jnp.float32),   # running sum l
            pltpu.VMEM((tq, Dq), jnp.float32),          # merged-head acc
        ],
        compiler_params=pltpu.CompilerParams(
            dimension_semantics=("parallel", "parallel", "arbitrary"),
            vmem_limit_bytes=_VMEM_LIMIT,
        ),
    )(q, kv)

    if Sq_pad != Sq:
        out = out[:, :Sq, :]
    return out


# -----------------------------------------------------------------------------
# Parameter preparation (done ONCE, outside the jitted forward):
#   - fuse wk|wv and bk|bv so K and V come from one projection pass
#   - fold 1/sqrt(head_size) into wq/bq (drops the in-kernel scale multiply)
#   - optional dtype cast (e.g. bf16 weights to feed the MXU at peak on
#     v6e/v7x; softmax statistics / accumulators stay f32 inside the kernels)
# -----------------------------------------------------------------------------
def prepare_params(params, num_heads, dtype=None):
    head_size = params["wq"].shape[1] // num_heads
    scale = 1.0 / math.sqrt(head_size)
    prepared = {
        "wq": params["wq"] * scale,
        "bq": params["bq"] * scale,
        "wkv": jnp.concatenate([params["wk"], params["wv"]], axis=1),
        "bkv": jnp.concatenate([params["bk"], params["bv"]], axis=0),
        "wp": params["wp"],
        "bp": params["bp"],
    }
    if dtype is not None:
        prepared = jax.tree_util.tree_map(lambda a: a.astype(dtype), prepared)
    return prepared


# -----------------------------------------------------------------------------
# CrossAttention forward (glue in plain JAX, hot paths in Pallas kernels)
# -----------------------------------------------------------------------------
def cross_attention_forward(prepared, hidden_states, encoder_hidden_states,
                            num_heads):
    """
    hidden_states:          (B, Sq, hidden_size)
    encoder_hidden_states:  (B, Sk, encoder_hidden_size)
    returns:                (B, Sq, hidden_size)
    """
    B, Sq, hidden_size = hidden_states.shape
    _, Sk, enc_hidden = encoder_hidden_states.shape
    all_head = prepared["wq"].shape[1]
    head_size = all_head // num_heads

    compute_dtype = prepared["wq"].dtype
    hs = hidden_states.astype(compute_dtype)
    ehs = encoder_hidden_states.astype(compute_dtype)

    # --- Q projection (scale already folded into wq/bq) ---
    q = linear(hs.reshape(B * Sq, hidden_size),
               prepared["wq"], prepared["bq"])                    # (B*Sq, H*hd)

    # --- fused K|V projection: one pass over encoder_hidden_states ---
    kv = linear(ehs.reshape(B * Sk, enc_hidden),
                prepared["wkv"], prepared["bkv"])                 # (B*Sk, 2*H*hd)

    # merged-head layout; reshapes are free views, no transposes.
    q = q.reshape(B, Sq, all_head)
    kv = kv.reshape(B, Sk, 2 * all_head)

    # --- attention (attn_dropout == identity) ---
    ctx = multi_head_attention(q, kv, num_heads=num_heads, head_size=head_size)

    # --- output projection (resid_dropout == identity) ---
    out = linear(ctx.reshape(B * Sq, all_head), prepared["wp"], prepared["bp"],
                 out_dtype=hidden_states.dtype)
    return out.reshape(B, Sq, hidden_size)


# -----------------------------------------------------------------------------
# Deterministic parameter init (shapes mirror the nn.Module __init__).
# Weights stored already transposed to (Din, Dout) for the x @ W convention.
# -----------------------------------------------------------------------------
def init_params(key, encoder_hidden_size, hidden_size, num_heads):
    all_head = hidden_size  # head_size * num_heads == hidden_size
    keys = jax.random.split(key, 8)

    def uniform(k, shape, fan_in):
        bound = 1.0 / math.sqrt(fan_in)
        return jax.random.uniform(k, shape, jnp.float32, -bound, bound)

    return {
        "wq": uniform(keys[0], (hidden_size, all_head), hidden_size),
        "bq": uniform(keys[1], (all_head,), hidden_size),
        "wk": uniform(keys[2], (encoder_hidden_size, all_head), encoder_hidden_size),
        "bk": uniform(keys[3], (all_head,), encoder_hidden_size),
        "wv": uniform(keys[4], (encoder_hidden_size, all_head), encoder_hidden_size),
        "bv": uniform(keys[5], (all_head,), encoder_hidden_size),
        "wp": uniform(keys[6], (hidden_size, hidden_size), hidden_size),
        "bp": uniform(keys[7], (hidden_size,), hidden_size),
    }


if __name__ == "__main__":
    # Small, deterministic example shapes
    B = 2
    Sq = 8                     # decoder / hidden sequence length
    Sk = 16                    # encoder sequence length
    hidden_size = 32
    encoder_hidden_size = 48
    num_heads = 4              # head_size = 8

    root = jax.random.PRNGKey(0)
    k_params, k_h, k_e = jax.random.split(root, 3)

    params = init_params(k_params, encoder_hidden_size, hidden_size, num_heads)
    prepared = prepare_params(params, num_heads)      # dtype=jnp.bfloat16 for MXU peak
    hidden_states = jax.random.normal(k_h, (B, Sq, hidden_size), jnp.float32)
    encoder_hidden_states = jax.random.normal(
        k_e, (B, Sk, encoder_hidden_size), jnp.float32)

    fwd = jax.jit(functools.partial(cross_attention_forward,
                                    num_heads=num_heads))
    out = fwd(prepared, hidden_states, encoder_hidden_states)
    out = jax.block_until_ready(out)

    # Pure-JAX reference check (same math as the PyTorch module, no Pallas)
    def ref_forward(p, hs, ehs):
        head = hidden_size // num_heads
        q = hs @ p["wq"] + p["bq"]
        k = ehs @ p["wk"] + p["bk"]
        v = ehs @ p["wv"] + p["bv"]

        def sh(x, S):
            return x.reshape(B, S, num_heads, head).transpose(0, 2, 1, 3)

        q, k, v = sh(q, Sq), sh(k, Sk), sh(v, Sk)
        s = jnp.einsum("bhqd,bhkd->bhqk", q, k) / math.sqrt(head)
        pby = jax.nn.softmax(s, axis=-1)
        ctx = jnp.einsum("bhqk,bhkd->bhqd", pby, v)
        ctx = ctx.transpose(0, 2, 1, 3).reshape(B, Sq, hidden_size)
        return ctx @ p["wp"] + p["bp"]

    ref = ref_forward(params, hidden_states, encoder_hidden_states)
    assert out.shape == (B, Sq, hidden_size)
    assert jnp.allclose(out, ref, atol=1e-4, rtol=1e-4), "mismatch vs reference"

    print("KERNEL_OK")
</pallas_src>

<mosaic_0001>
module attributes {stable_mosaic.version = 11 : i64} {
  func.func @_mha_flash_kernel(%arg0: i32, %arg1: i32, %arg2: i32, %arg3: memref<1x8x32xf32, #tpu.memory_space<vmem>>, %arg4: memref<1x16x64xf32, #tpu.memory_space<vmem>>, %arg5: memref<1x8x32xf32, #tpu.memory_space<vmem>>, %arg6: memref<8x4xf32, #tpu.memory_space<vmem>>, %arg7: memref<8x4xf32, #tpu.memory_space<vmem>>, %arg8: memref<8x32xf32, #tpu.memory_space<vmem>>) attributes {dimension_semantics = [#tpu.dimension_semantics<parallel>, #tpu.dimension_semantics<parallel>, #tpu.dimension_semantics<arbitrary>], iteration_bounds = array<i64: 2, 1, 1>, scalar_prefetch = 0 : i64, scratch_operands = 3 : i64, tpu.core_type = #tpu.core_type<tc>, window_params = [{transform_indices = @transform_0, window_bounds = array<i64: 1, 8, 32>}, {transform_indices = @transform_1, window_bounds = array<i64: 1, 16, 64>}, {transform_indices = @transform_2, window_bounds = array<i64: 1, 8, 32>}]} {
    %c0_i32 = arith.constant 0 : i32
    %0 = arith.cmpi eq, %arg2, %c0_i32 : i32
    %1 = arith.extui %0 : i1 to i32
    %c0_i32_0 = arith.constant 0 : i32
    %2 = arith.cmpi ne, %1, %c0_i32_0 : i32
    scf.if %2 {
      %cst_65 = arith.constant -1.000000e+30 : f32
      %114 = vector.broadcast %cst_65 : f32 to vector<8x4xf32>
      %c0_66 = arith.constant 0 : index
      %c0_67 = arith.constant 0 : index
      %115 = vector.load %arg6[%c0_66, %c0_67] : memref<8x4xf32, #tpu.memory_space<vmem>>, vector<8x4xf32>
      tpu.vector_store %arg6[%c0_66, %c0_67], %114 {strides = array<i32>} : memref<8x4xf32, #tpu.memory_space<vmem>>, vector<8x4xf32>,
      %cst_68 = arith.constant 0.000000e+00 : f32
      %116 = vector.broadcast %cst_68 : f32 to vector<8x4xf32>
      %c0_69 = arith.constant 0 : index
      %c0_70 = arith.constant 0 : index
      %117 = vector.load %arg7[%c0_69, %c0_70] : memref<8x4xf32, #tpu.memory_space<vmem>>, vector<8x4xf32>
      tpu.vector_store %arg7[%c0_69, %c0_70], %116 {strides = array<i32>} : memref<8x4xf32, #tpu.memory_space<vmem>>, vector<8x4xf32>,
      %cst_71 = arith.constant 0.000000e+00 : f32
      %118 = vector.broadcast %cst_71 : f32 to vector<8x32xf32>
      %c0_72 = arith.constant 0 : index
      %c0_73 = arith.constant 0 : index
      %119 = vector.load %arg8[%c0_72, %c0_73] : memref<8x32xf32, #tpu.memory_space<vmem>>, vector<8x32xf32>
      tpu.vector_store %arg8[%c0_72, %c0_73], %118 {strides = array<i32>} : memref<8x32xf32, #tpu.memory_space<vmem>>, vector<8x32xf32>,
    } else {
    }
    %c0 = arith.constant 0 : index
    %c0_1 = arith.constant 0 : index
    %c0_2 = arith.constant 0 : index
    %3 = vector.load %arg3[%c0, %c0_1, %c0_2] : memref<1x8x32xf32, #tpu.memory_space<vmem>>, vector<1x8x32xf32>
    %4 = vector.shape_cast %3 : vector<1x8x32xf32> to vector<8x32xf32>
    %c0_3 = arith.constant 0 : index
    %c0_4 = arith.constant 0 : index
    %c0_5 = arith.constant 0 : index
    %5 = vector.load %arg4[%c0_3, %c0_4, %c0_5] : memref<1x16x64xf32, #tpu.memory_space<vmem>>, vector<1x16x64xf32>
    %6 = vector.shape_cast %5 : vector<1x16x64xf32> to vector<16x64xf32>
    %7 = vector.extract_strided_slice %4 {offsets = [0, 0], sizes = [8, 8], strides = [1, 1]} : vector<8x32xf32> to vector<8x8xf32>
    %8 = vector.extract_strided_slice %6 {offsets = [0, 0], sizes = [16, 8], strides = [1, 1]} : vector<16x64xf32> to vector<16x8xf32>
    %9 = vector.extract_strided_slice %6 {offsets = [0, 32], sizes = [16, 8], strides = [1, 1]} : vector<16x64xf32> to vector<16x8xf32>
    %cst = arith.constant dense<0.000000e+00> : vector<8x16xf32>
    %10 = tpu.matmul %7, %8, %cst {dimension_numbers = #tpu.dot_dimension_numbers<[1], [1], [0], [0], [0, 0, 1, 0], [], []>} : vector<8x8xf32>, vector<16x8xf32>, vector<8x16xf32> -> vector<8x16xf32>
    %c0_6 = arith.constant 0 : index
    %c0_7 = arith.constant 0 : index
    %11 = vector.load %arg6[%c0_6, %c0_7] : memref<8x4xf32, #tpu.memory_space<vmem>>, vector<8x1xf32>
    %c0_8 = arith.constant 0 : index
    %c0_9 = arith.constant 0 : index
    %12 = vector.load %arg7[%c0_8, %c0_9] : memref<8x4xf32, #tpu.memory_space<vmem>>, vector<8x1xf32>
    %cst_10 = arith.constant dense<0xFF800000> : vector<8xf32>
    %13 = vector.multi_reduction <maximumf>, %10, %cst_10 [1] : vector<8x16xf32> to vector<8xf32>
    %14 = vector.shape_cast %13 : vector<8xf32> to vector<8x1xf32>
    %15 = arith.maximumf %11, %14 : vector<8x1xf32>
    %16 = arith.subf %11, %15 : vector<8x1xf32>
    %17 = math.exp %16 : vector<8x1xf32>
    %18 = vector.broadcast %15 : vector<8x1xf32> to vector<8x16xf32>
    %19 = arith.subf %10, %18 : vector<8x16xf32>
    %20 = math.exp %19 : vector<8x16xf32>
    %21 = arith.mulf %17, %12 : vector<8x1xf32>
    %cst_11 = arith.constant dense<0.000000e+00> : vector<8xf32>
    %22 = vector.multi_reduction <add>, %20, %cst_11 [1] : vector<8x16xf32> to vector<8xf32>
    %23 = vector.shape_cast %22 : vector<8xf32> to vector<8x1xf32>
    %24 = arith.addf %21, %23 : vector<8x1xf32>
    %c0_12 = arith.constant 0 : index
    %c0_13 = arith.constant 0 : index
    %25 = vector.load %arg7[%c0_12, %c0_13] : memref<8x4xf32, #tpu.memory_space<vmem>>, vector<8x1xf32>
    tpu.vector_store %arg7[%c0_12, %c0_13], %24 {strides = array<i32>} : memref<8x4xf32, #tpu.memory_space<vmem>>, vector<8x1xf32>,
    %cst_14 = arith.constant dense<0.000000e+00> : vector<8x8xf32>
    %26 = tpu.matmul %20, %9, %cst_14 {dimension_numbers = #tpu.dot_dimension_numbers<[1], [0], [0], [1], [0, 0, 1, 1], [], []>} : vector<8x16xf32>, vector<16x8xf32>, vector<8x8xf32> -> vector<8x8xf32>
    %c0_15 = arith.constant 0 : index
    %c0_16 = arith.constant 0 : index
    %27 = vector.load %arg8[%c0_15, %c0_16] : memref<8x32xf32, #tpu.memory_space<vmem>>, vector<8x8xf32>
    %28 = vector.broadcast %17 : vector<8x1xf32> to vector<8x8xf32>
    %29 = arith.mulf %28, %27 : vector<8x8xf32>
    %30 = arith.addf %29, %26 : vector<8x8xf32>
    %c0_17 = arith.constant 0 : index
    %c0_18 = arith.constant 0 : index
    %31 = vector.load %arg8[%c0_17, %c0_18] : memref<8x32xf32, #tpu.memory_space<vmem>>, vector<8x8xf32>
    tpu.vector_store %arg8[%c0_17, %c0_18], %30 {strides = array<i32>} : memref<8x32xf32, #tpu.memory_space<vmem>>, vector<8x8xf32>,
    %c0_19 = arith.constant 0 : index
    %c0_20 = arith.constant 0 : index
    %32 = vector.load %arg6[%c0_19, %c0_20] : memref<8x4xf32, #tpu.memory_space<vmem>>, vector<8x1xf32>
    tpu.vector_store %arg6[%c0_19, %c0_20], %15 {strides = array<i32>} : memref<8x4xf32, #tpu.memory_space<vmem>>, vector<8x1xf32>,
    %33 = vector.extract_strided_slice %4 {offsets = [0, 8], sizes = [8, 8], strides = [1, 1]} : vector<8x32xf32> to vector<8x8xf32>
    %34 = vector.extract_strided_slice %6 {offsets = [0, 8], sizes = [16, 8], strides = [1, 1]} : vector<16x64xf32> to vector<16x8xf32>
    %35 = vector.extract_strided_slice %6 {offsets = [0, 40], sizes = [16, 8], strides = [1, 1]} : vector<16x64xf32> to vector<16x8xf32>
    %cst_21 = arith.constant dense<0.000000e+00> : vector<8x16xf32>
    %36 = tpu.matmul %33, %34, %cst_21 {dimension_numbers = #tpu.dot_dimension_numbers<[1], [1], [0], [0], [0, 0, 1, 0], [], []>} : vector<8x8xf32>, vector<16x8xf32>, vector<8x16xf32> -> vector<8x16xf32>
    %c0_22 = arith.constant 0 : index
    %c1 = arith.constant 1 : index
    %37 = vector.load %arg6[%c0_22, %c1] : memref<8x4xf32, #tpu.memory_space<vmem>>, vector<8x1xf32>
    %c0_23 = arith.constant 0 : index
    %c1_24 = arith.constant 1 : index
    %38 = vector.load %arg7[%c0_23, %c1_24] : memref<8x4xf32, #tpu.memory_space<vmem>>, vector<8x1xf32>
    %cst_25 = arith.constant dense<0xFF800000> : vector<8xf32>
    %39 = vector.multi_reduction <maximumf>, %36, %cst_25 [1] : vector<8x16xf32> to vector<8xf32>
    %40 = vector.shape_cast %39 : vector<8xf32> to vector<8x1xf32>
    %41 = arith.maximumf %37, %40 : vector<8x1xf32>
    %42 = arith.subf %37, %41 : vector<8x1xf32>
    %43 = math.exp %42 : vector<8x1xf32>
    %44 = vector.broadcast %41 : vector<8x1xf32> to vector<8x16xf32>
    %45 = arith.subf %36, %44 : vector<8x16xf32>
    %46 = math.exp %45 : vector<8x16xf32>
    %47 = arith.mulf %43, %38 : vector<8x1xf32>
    %cst_26 = arith.constant dense<0.000000e+00> : vector<8xf32>
    %48 = vector.multi_reduction <add>, %46, %cst_26 [1] : vector<8x16xf32> to vector<8xf32>
    %49 = vector.shape_cast %48 : vector<8xf32> to vector<8x1xf32>
    %50 = arith.addf %47, %49 : vector<8x1xf32>
    %c0_27 = arith.constant 0 : index
    %c1_28 = arith.constant 1 : index
    %51 = vector.load %arg7[%c0_27, %c1_28] : memref<8x4xf32, #tpu.memory_space<vmem>>, vector<8x1xf32>
    tpu.vector_store %arg7[%c0_27, %c1_28], %50 {strides = array<i32>} : memref<8x4xf32, #tpu.memory_space<vmem>>, vector<8x1xf32>,
    %cst_29 = arith.constant dense<0.000000e+00> : vector<8x8xf32>
    %52 = tpu.matmul %46, %35, %cst_29 {dimension_numbers = #tpu.dot_dimension_numbers<[1], [0], [0], [1], [0, 0, 1, 1], [], []>} : vector<8x16xf32>, vector<16x8xf32>, vector<8x8xf32> -> vector<8x8xf32>
    %c0_30 = arith.constant 0 : index
    %c8 = arith.constant 8 : index
    %53 = vector.load %arg8[%c0_30, %c8] : memref<8x32xf32, #tpu.memory_space<vmem>>, vector<8x8xf32>
    %54 = vector.broadcast %43 : vector<8x1xf32> to vector<8x8xf32>
    %55 = arith.mulf %54, %53 : vector<8x8xf32>
    %56 = arith.addf %55, %52 : vector<8x8xf32>
    %c0_31 = arith.constant 0 : index
    %c8_32 = arith.constant 8 : index
    %57 = vector.load %arg8[%c0_31, %c8_32] : memref<8x32xf32, #tpu.memory_space<vmem>>, vector<8x8xf32>
    tpu.vector_store %arg8[%c0_31, %c8_32], %56 {strides = array<i32>} : memref<8x32xf32, #tpu.memory_space<vmem>>, vector<8x8xf32>,
    %c0_33 = arith.constant 0 : index
    %c1_34 = arith.constant 1 : index
    %58 = vector.load %arg6[%c0_33, %c1_34] : memref<8x4xf32, #tpu.memory_space<vmem>>, vector<8x1xf32>
    tpu.vector_store %arg6[%c0_33, %c1_34], %41 {strides = array<i32>} : memref<8x4xf32, #tpu.memory_space<vmem>>, vector<8x1xf32>,
    %59 = vector.extract_strided_slice %4 {offsets = [0, 16], sizes = [8, 8], strides = [1, 1]} : vector<8x32xf32> to vector<8x8xf32>
    %60 = vector.extract_strided_slice %6 {offsets = [0, 16], sizes = [16, 8], strides = [1, 1]} : vector<16x64xf32> to vector<16x8xf32>
    %61 = vector.extract_strided_slice %6 {offsets = [0, 48], sizes = [16, 8], strides = [1, 1]} : vector<16x64xf32> to vector<16x8xf32>
    %cst_35 = arith.constant dense<0.000000e+00> : vector<8x16xf32>
    %62 = tpu.matmul %59, %60, %cst_35 {dimension_numbers = #tpu.dot_dimension_numbers<[1], [1], [0], [0], [0, 0, 1, 0], [], []>} : vector<8x8xf32>, vector<16x8xf32>, vector<8x16xf32> -> vector<8x16xf32>
    %c0_36 = arith.constant 0 : index
    %c2 = arith.constant 2 : index
    %63 = vector.load %arg6[%c0_36, %c2] : memref<8x4xf32, #tpu.memory_space<vmem>>, vector<8x1xf32>
    %c0_37 = arith.constant 0 : index
    %c2_38 = arith.constant 2 : index
    %64 = vector.load %arg7[%c0_37, %c2_38] : memref<8x4xf32, #tpu.memory_space<vmem>>, vector<8x1xf32>
    %cst_39 = arith.constant dense<0xFF800000> : vector<8xf32>
    %65 = vector.multi_reduction <maximumf>, %62, %cst_39 [1] : vector<8x16xf32> to vector<8xf32>
    %66 = vector.shape_cast %65 : vector<8xf32> to vector<8x1xf32>
    %67 = arith.maximumf %63, %66 : vector<8x1xf32>
    %68 = arith.subf %63, %67 : vector<8x1xf32>
    %69 = math.exp %68 : vector<8x1xf32>
    %70 = vector.broadcast %67 : vector<8x1xf32> to vector<8x16xf32>
    %71 = arith.subf %62, %70 : vector<8x16xf32>
    %72 = math.exp %71 : vector<8x16xf32>
    %73 = arith.mulf %69, %64 : vector<8x1xf32>
    %cst_40 = arith.constant dense<0.000000e+00> : vector<8xf32>
    %74 = vector.multi_reduction <add>, %72, %cst_40 [1] : vector<8x16xf32> to vector<8xf32>
    %75 = vector.shape_cast %74 : vector<8xf32> to vector<8x1xf32>
    %76 = arith.addf %73, %75 : vector<8x1xf32>
    %c0_41 = arith.constant 0 : index
    %c2_42 = arith.constant 2 : index
    %77 = vector.load %arg7[%c0_41, %c2_42] : memref<8x4xf32, #tpu.memory_space<vmem>>, vector<8x1xf32>
    tpu.vector_store %arg7[%c0_41, %c2_42], %76 {strides = array<i32>} : memref<8x4xf32, #tpu.memory_space<vmem>>, vector<8x1xf32>,
    %cst_43 = arith.constant dense<0.000000e+00> : vector<8x8xf32>
    %78 = tpu.matmul %72, %61, %cst_43 {dimension_numbers = #tpu.dot_dimension_numbers<[1], [0], [0], [1], [0, 0, 1, 1], [], []>} : vector<8x16xf32>, vector<16x8xf32>, vector<8x8xf32> -> vector<8x8xf32>
    %c0_44 = arith.constant 0 : index
    %c16 = arith.constant 16 : index
    %79 = vector.load %arg8[%c0_44, %c16] : memref<8x32xf32, #tpu.memory_space<vmem>>, vector<8x8xf32>
    %80 = vector.broadcast %69 : vector<8x1xf32> to vector<8x8xf32>
    %81 = arith.mulf %80, %79 : vector<8x8xf32>
    %82 = arith.addf %81, %78 : vector<8x8xf32>
    %c0_45 = arith.constant 0 : index
    %c16_46 = arith.constant 16 : index
    %83 = vector.load %arg8[%c0_45, %c16_46] : memref<8x32xf32, #tpu.memory_space<vmem>>, vector<8x8xf32>
    tpu.vector_store %arg8[%c0_45, %c16_46], %82 {strides = array<i32>} : memref<8x32xf32, #tpu.memory_space<vmem>>, vector<8x8xf32>,
    %c0_47 = arith.constant 0 : index
    %c2_48 = arith.constant 2 : index
    %84 = vector.load %arg6[%c0_47, %c2_48] : memref<8x4xf32, #tpu.memory_space<vmem>>, vector<8x1xf32>
    tpu.vector_store %arg6[%c0_47, %c2_48], %67 {strides = array<i32>} : memref<8x4xf32, #tpu.memory_space<vmem>>, vector<8x1xf32>,
    %85 = vector.extract_strided_slice %4 {offsets = [0, 24], sizes = [8, 8], strides = [1, 1]} : vector<8x32xf32> to vector<8x8xf32>
    %86 = vector.extract_strided_slice %6 {offsets = [0, 24], sizes = [16, 8], strides = [1, 1]} : vector<16x64xf32> to vector<16x8xf32>
    %87 = vector.extract_strided_slice %6 {offsets = [0, 56], sizes = [16, 8], strides = [1, 1]} : vector<16x64xf32> to vector<16x8xf32>
    %cst_49 = arith.constant dense<0.000000e+00> : vector<8x16xf32>
    %88 = tpu.matmul %85, %86, %cst_49 {dimension_numbers = #tpu.dot_dimension_numbers<[1], [1], [0], [0], [0, 0, 1, 0], [], []>} : vector<8x8xf32>, vector<16x8xf32>, vector<8x16xf32> -> vector<8x16xf32>
    %c0_50 = arith.constant 0 : index
    %c3 = arith.constant 3 : index
    %89 = vector.load %arg6[%c0_50, %c3] : memref<8x4xf32, #tpu.memory_space<vmem>>, vector<8x1xf32>
    %c0_51 = arith.constant 0 : index
    %c3_52 = arith.constant 3 : index
    %90 = vector.load %arg7[%c0_51, %c3_52] : memref<8x4xf32, #tpu.memory_space<vmem>>, vector<8x1xf32>
    %cst_53 = arith.constant dense<0xFF800000> : vector<8xf32>
    %91 = vector.multi_reduction <maximumf>, %88, %cst_53 [1] : vector<8x16xf32> to vector<8xf32>
    %92 = vector.shape_cast %91 : vector<8xf32> to vector<8x1xf32>
    %93 = arith.maximumf %89, %92 : vector<8x1xf32>
    %94 = arith.subf %89, %93 : vector<8x1xf32>
    %95 = math.exp %94 : vector<8x1xf32>
    %96 = vector.broadcast %93 : vector<8x1xf32> to vector<8x16xf32>
    %97 = arith.subf %88, %96 : vector<8x16xf32>
    %98 = math.exp %97 : vector<8x16xf32>
    %99 = arith.mulf %95, %90 : vector<8x1xf32>
    %cst_54 = arith.constant dense<0.000000e+00> : vector<8xf32>
    %100 = vector.multi_reduction <add>, %98, %cst_54 [1] : vector<8x16xf32> to vector<8xf32>
    %101 = vector.shape_cast %100 : vector<8xf32> to vector<8x1xf32>
    %102 = arith.addf %99, %101 : vector<8x1xf32>
    %c0_55 = arith.constant 0 : index
    %c3_56 = arith.constant 3 : index
    %103 = vector.load %arg7[%c0_55, %c3_56] : memref<8x4xf32, #tpu.memory_space<vmem>>, vector<8x1xf32>
    tpu.vector_store %arg7[%c0_55, %c3_56], %102 {strides = array<i32>} : memref<8x4xf32, #tpu.memory_space<vmem>>, vector<8x1xf32>,
    %cst_57 = arith.constant dense<0.000000e+00> : vector<8x8xf32>
    %104 = tpu.matmul %98, %87, %cst_57 {dimension_numbers = #tpu.dot_dimension_numbers<[1], [0], [0], [1], [0, 0, 1, 1], [], []>} : vector<8x16xf32>, vector<16x8xf32>, vector<8x8xf32> -> vector<8x8xf32>
    %c0_58 = arith.constant 0 : index
    %c24 = arith.constant 24 : index
    %105 = vector.load %arg8[%c0_58, %c24] : memref<8x32xf32, #tpu.memory_space<vmem>>, vector<8x8xf32>
    %106 = vector.broadcast %95 : vector<8x1xf32> to vector<8x8xf32>
    %107 = arith.mulf %106, %105 : vector<8x8xf32>
    %108 = arith.addf %107, %104 : vector<8x8xf32>
    %c0_59 = arith.constant 0 : index
    %c24_60 = arith.constant 24 : index
    %109 = vector.load %arg8[%c0_59, %c24_60] : memref<8x32xf32, #tpu.memory_space<vmem>>, vector<8x8xf32>
    tpu.vector_store %arg8[%c0_59, %c24_60], %108 {strides = array<i32>} : memref<8x32xf32, #tpu.memory_space<vmem>>, vector<8x8xf32>,
    %c0_61 = arith.constant 0 : index
    %c3_62 = arith.constant 3 : index
    %110 = vector.load %arg6[%c0_61, %c3_62] : memref<8x4xf32, #tpu.memory_space<vmem>>, vector<8x1xf32>
    tpu.vector_store %arg6[%c0_61, %c3_62], %93 {strides = array<i32>} : memref<8x4xf32, #tpu.memory_space<vmem>>, vector<8x1xf32>,
    %c0_i32_63 = arith.constant 0 : i32
    %111 = arith.cmpi eq, %arg2, %c0_i32_63 : i32
    %112 = arith.extui %111 : i1 to i32
    %c0_i32_64 = arith.constant 0 : i32
    %113 = arith.cmpi ne, %112, %c0_i32_64 : i32
    scf.if %113 {
      %c0_65 = arith.constant 0 : index
      %c0_66 = arith.constant 0 : index
      %114 = vector.load %arg7[%c0_65, %c0_66] : memref<8x4xf32, #tpu.memory_space<vmem>>, vector<8x4xf32>
      %cst_67 = arith.constant 1.000000e+00 : f32
      %115 = vector.broadcast %cst_67 : f32 to vector<8x4xf32>
      %116 = arith.divf %115, %114 : vector<8x4xf32>
      %c0_68 = arith.constant 0 : index
      %c0_69 = arith.constant 0 : index
      %117 = vector.load %arg8[%c0_68, %c0_69] : memref<8x32xf32, #tpu.memory_space<vmem>>, vector<8x8xf32>
      %118 = vector.extract_strided_slice %116 {offsets = [0, 0], sizes = [8, 1], strides = [1, 1]} : vector<8x4xf32> to vector<8x1xf32>
      %119 = vector.broadcast %118 : vector<8x1xf32> to vector<8x8xf32>
      %120 = arith.mulf %117, %119 : vector<8x8xf32>
      %c0_70 = arith.constant 0 : index
      %c0_71 = arith.constant 0 : index
      %121 = vector.load %arg8[%c0_70, %c0_71] : memref<8x32xf32, #tpu.memory_space<vmem>>, vector<8x8xf32>
      tpu.vector_store %arg8[%c0_70, %c0_71], %120 {strides = array<i32>} : memref<8x32xf32, #tpu.memory_space<vmem>>, vector<8x8xf32>,
      %c0_72 = arith.constant 0 : index
      %c8_73 = arith.constant 8 : index
      %122 = vector.load %arg8[%c0_72, %c8_73] : memref<8x32xf32, #tpu.memory_space<vmem>>, vector<8x8xf32>
      %123 = vector.extract_strided_slice %116 {offsets = [0, 1], sizes = [8, 1], strides = [1, 1]} : vector<8x4xf32> to vector<8x1xf32>
      %124 = vector.broadcast %123 : vector<8x1xf32> to vector<8x8xf32>
      %125 = arith.mulf %122, %124 : vector<8x8xf32>
      %c0_74 = arith.constant 0 : index
      %c8_75 = arith.constant 8 : index
      %126 = vector.load %arg8[%c0_74, %c8_75] : memref<8x32xf32, #tpu.memory_space<vmem>>, vector<8x8xf32>
      tpu.vector_store %arg8[%c0_74, %c8_75], %125 {strides = array<i32>} : memref<8x32xf32, #tpu.memory_space<vmem>>, vector<8x8xf32>,
      %c0_76 = arith.constant 0 : index
      %c16_77 = arith.constant 16 : index
      %127 = vector.load %arg8[%c0_76, %c16_77] : memref<8x32xf32, #tpu.memory_space<vmem>>, vector<8x8xf32>
      %128 = vector.extract_strided_slice %116 {offsets = [0, 2], sizes = [8, 1], strides = [1, 1]} : vector<8x4xf32> to vector<8x1xf32>
      %129 = vector.broadcast %128 : vector<8x1xf32> to vector<8x8xf32>
      %130 = arith.mulf %127, %129 : vector<8x8xf32>
      %c0_78 = arith.constant 0 : index
      %c16_79 = arith.constant 16 : index
      %131 = vector.load %arg8[%c0_78, %c16_79] : memref<8x32xf32, #tpu.memory_space<vmem>>, vector<8x8xf32>
      tpu.vector_store %arg8[%c0_78, %c16_79], %130 {strides = array<i32>} : memref<8x32xf32, #tpu.memory_space<vmem>>, vector<8x8xf32>,
      %c0_80 = arith.constant 0 : index
      %c24_81 = arith.constant 24 : index
      %132 = vector.load %arg8[%c0_80, %c24_81] : memref<8x32xf32, #tpu.memory_space<vmem>>, vector<8x8xf32>
      %133 = vector.extract_strided_slice %116 {offsets = [0, 3], sizes = [8, 1], strides = [1, 1]} : vector<8x4xf32> to vector<8x1xf32>
      %134 = vector.broadcast %133 : vector<8x1xf32> to vector<8x8xf32>
      %135 = arith.mulf %132, %134 : vector<8x8xf32>
      %c0_82 = arith.constant 0 : index
      %c24_83 = arith.constant 24 : index
      %136 = vector.load %arg8[%c0_82, %c24_83] : memref<8x32xf32, #tpu.memory_space<vmem>>, vector<8x8xf32>
      tpu.vector_store %arg8[%c0_82, %c24_83], %135 {strides = array<i32>} : memref<8x32xf32, #tpu.memory_space<vmem>>, vector<8x8xf32>,
      %c0_84 = arith.constant 0 : index
      %c0_85 = arith.constant 0 : index
      %137 = vector.load %arg8[%c0_84, %c0_85] : memref<8x32xf32, #tpu.memory_space<vmem>>, vector<8x32xf32>
      %c0_86 = arith.constant 0 : index
      %c0_87 = arith.constant 0 : index
      %c0_88 = arith.constant 0 : index
      %138 = vector.load %arg5[%c0_86, %c0_87, %c0_88] : memref<1x8x32xf32, #tpu.memory_space<vmem>>, vector<1x8x32xf32>
      %139 = vector.shape_cast %138 : vector<1x8x32xf32> to vector<8x32xf32>
      %140 = vector.shape_cast %137 : vector<8x32xf32> to vector<1x8x32xf32>
      tpu.vector_store %arg5[%c0_86, %c0_87, %c0_88], %140 {strides = array<i32>} : memref<1x8x32xf32, #tpu.memory_space<vmem>>, vector<1x8x32xf32>,
    } else {
    }
    return
  }
  func.func @transform_0(%arg0: i32, %arg1: i32, %arg2: i32) -> (i32, i32, i32) {
    %c0_i32 = arith.constant 0 : i32
    %c0_i32_0 = arith.constant 0 : i32
    return %arg0, %arg1, %c0_i32 : i32, i32, i32
  }
  func.func @transform_1(%arg0: i32, %arg1: i32, %arg2: i32) -> (i32, i32, i32) {
    %c0_i32 = arith.constant 0 : i32
    %c0_i32_0 = arith.constant 0 : i32
    return %arg0, %arg2, %c0_i32 : i32, i32, i32
  }
  func.func @transform_2(%arg0: i32, %arg1: i32, %arg2: i32) -> (i32, i32, i32) {
    %c0_i32 = arith.constant 0 : i32
    %c0_i32_0 = arith.constant 0 : i32
    return %arg0, %arg1, %c0_i32 : i32, i32, i32
  }
}

module attributes {stable_mosaic.version = 11 : i64} {
  func.func @_linear_kernel(%arg0: i32, %arg1: i32, %arg2: i32, %arg3: memref<16x32xf32, #tpu.memory_space<vmem>>, %arg4: memref<32x32xf32, #tpu.memory_space<vmem>>, %arg5: memref<1x32xf32, #tpu.memory_space<vmem>>, %arg6: memref<16x32xf32, #tpu.memory_space<vmem>>, %arg7: memref<16x32xf32, #tpu.memory_space<vmem>>) attributes {dimension_semantics = [#tpu.dimension_semantics<parallel>, #tpu.dimension_semantics<parallel>, #tpu.dimension_semantics<arbitrary>], iteration_bounds = array<i64: 1, 1, 1>, scalar_prefetch = 0 : i64, scratch_operands = 1 : i64, tpu.core_type = #tpu.core_type<tc>, window_params = [{transform_indices = @transform_0, window_bounds = array<i64: 16, 32>}, {transform_indices = @transform_1, window_bounds = array<i64: 32, 32>}, {transform_indices = @transform_2, window_bounds = array<i64: 1, 32>}, {transform_indices = @transform_3, window_bounds = array<i64: 16, 32>}]} {
    %c0_i32 = arith.constant 0 : i32
    %0 = arith.cmpi eq, %arg2, %c0_i32 : i32
    %1 = arith.extui %0 : i1 to i32
    %c0_i32_0 = arith.constant 0 : i32
    %2 = arith.cmpi ne, %1, %c0_i32_0 : i32
    scf.if %2 {
      %cst_10 = arith.constant 0.000000e+00 : f32
      %12 = vector.broadcast %cst_10 : f32 to vector<16x32xf32>
      %c0_11 = arith.constant 0 : index
      %c0_12 = arith.constant 0 : index
      %13 = vector.load %arg7[%c0_11, %c0_12] : memref<16x32xf32, #tpu.memory_space<vmem>>, vector<16x32xf32>
      tpu.vector_store %arg7[%c0_11, %c0_12], %12 {strides = array<i32>} : memref<16x32xf32, #tpu.memory_space<vmem>>, vector<16x32xf32>,
    } else {
    }
    %c0 = arith.constant 0 : index
    %c0_1 = arith.constant 0 : index
    %3 = vector.load %arg7[%c0, %c0_1] : memref<16x32xf32, #tpu.memory_space<vmem>>, vector<16x32xf32>
    %c0_2 = arith.constant 0 : index
    %c0_3 = arith.constant 0 : index
    %4 = vector.load %arg3[%c0_2, %c0_3] : memref<16x32xf32, #tpu.memory_space<vmem>>, vector<16x32xf32>
    %c0_4 = arith.constant 0 : index
    %c0_5 = arith.constant 0 : index
    %5 = vector.load %arg4[%c0_4, %c0_5] : memref<32x32xf32, #tpu.memory_space<vmem>>, vector<32x32xf32>
    %cst = arith.constant dense<0.000000e+00> : vector<16x32xf32>
    %6 = tpu.matmul %4, %5, %cst {dimension_numbers = #tpu.dot_dimension_numbers<[1], [0], [0], [1], [0, 0, 1, 1], [], []>} : vector<16x32xf32>, vector<32x32xf32>, vector<16x32xf32> -> vector<16x32xf32>
    %7 = arith.addf %3, %6 : vector<16x32xf32>
    %c0_6 = arith.constant 0 : index
    %c0_7 = arith.constant 0 : index
    %8 = vector.load %arg7[%c0_6, %c0_7] : memref<16x32xf32, #tpu.memory_space<vmem>>, vector<16x32xf32>
    tpu.vector_store %arg7[%c0_6, %c0_7], %7 {strides = array<i32>} : memref<16x32xf32, #tpu.memory_space<vmem>>, vector<16x32xf32>,
    %c0_i32_8 = arith.constant 0 : i32
    %9 = arith.cmpi eq, %arg2, %c0_i32_8 : i32
    %10 = arith.extui %9 : i1 to i32
    %c0_i32_9 = arith.constant 0 : i32
    %11 = arith.cmpi ne, %10, %c0_i32_9 : i32
    scf.if %11 {
      %c0_10 = arith.constant 0 : index
      %c0_11 = arith.constant 0 : index
      %12 = vector.load %arg7[%c0_10, %c0_11] : memref<16x32xf32, #tpu.memory_space<vmem>>, vector<16x32xf32>
      %c0_12 = arith.constant 0 : index
      %c0_13 = arith.constant 0 : index
      %13 = vector.load %arg5[%c0_12, %c0_13] : memref<1x32xf32, #tpu.memory_space<vmem>>, vector<1x32xf32>
      %14 = vector.broadcast %13 : vector<1x32xf32> to vector<16x32xf32>
      %15 = arith.addf %12, %14 : vector<16x32xf32>
      %c0_14 = arith.constant 0 : index
      %c0_15 = arith.constant 0 : index
      %16 = vector.load %arg6[%c0_14, %c0_15] : memref<16x32xf32, #tpu.memory_space<vmem>>, vector<16x32xf32>
      tpu.vector_store %arg6[%c0_14, %c0_15], %15 {strides = array<i32>} : memref<16x32xf32, #tpu.memory_space<vmem>>, vector<16x32xf32>,
    } else {
    }
    return
  }
  func.func @transform_0(%arg0: i32, %arg1: i32, %arg2: i32) -> (i32, i32) {
    %c0_i32 = arith.constant 0 : i32
    return %arg0, %arg2 : i32, i32
  }
  func.func @transform_1(%arg0: i32, %arg1: i32, %arg2: i32) -> (i32, i32) {
    %c0_i32 = arith.constant 0 : i32
    return %arg2, %arg1 : i32, i32
  }
  func.func @transform_2(%arg0: i32, %arg1: i32, %arg2: i32) -> (i32, i32) {
    %c0_i32 = arith.constant 0 : i32
    %c0_i32_0 = arith.constant 0 : i32
    return %c0_i32, %arg1 : i32, i32
  }
  func.func @transform_3(%arg0: i32, %arg1: i32, %arg2: i32) -> (i32, i32) {
    %c0_i32 = arith.constant 0 : i32
    return %arg0, %arg1 : i32, i32
  }
}

module attributes {stable_mosaic.version = 11 : i64} {
  func.func @_linear_kernel(%arg0: i32, %arg1: i32, %arg2: i32, %arg3: memref<16x32xf32, #tpu.memory_space<vmem>>, %arg4: memref<32x32xf32, #tpu.memory_space<vmem>>, %arg5: memref<1x32xf32, #tpu.memory_space<vmem>>, %arg6: memref<16x32xf32, #tpu.memory_space<vmem>>, %arg7: memref<16x32xf32, #tpu.memory_space<vmem>>) attributes {dimension_semantics = [#tpu.dimension_semantics<parallel>, #tpu.dimension_semantics<parallel>, #tpu.dimension_semantics<arbitrary>], iteration_bounds = array<i64: 1, 1, 1>, scalar_prefetch = 0 : i64, scratch_operands = 1 : i64, tpu.core_type = #tpu.core_type<tc>, window_params = [{transform_indices = @transform_0, window_bounds = array<i64: 16, 32>}, {transform_indices = @transform_1, window_bounds = array<i64: 32, 32>}, {transform_indices = @transform_2, window_bounds = array<i64: 1, 32>}, {transform_indices = @transform_3, window_bounds = array<i64: 16, 32>}]} {
    %c0_i32 = arith.constant 0 : i32
    %0 = arith.cmpi eq, %arg2, %c0_i32 : i32
    %1 = arith.extui %0 : i1 to i32
    %c0_i32_0 = arith.constant 0 : i32
    %2 = arith.cmpi ne, %1, %c0_i32_0 : i32
    scf.if %2 {
      %cst_10 = arith.constant 0.000000e+00 : f32
      %12 = vector.broadcast %cst_10 : f32 to vector<16x32xf32>
      %c0_11 = arith.constant 0 : index
      %c0_12 = arith.constant 0 : index
      %13 = vector.load %arg7[%c0_11, %c0_12] : memref<16x32xf32, #tpu.memory_space<vmem>>, vector<16x32xf32>
      tpu.vector_store %arg7[%c0_11, %c0_12], %12 {strides = array<i32>} : memref<16x32xf32, #tpu.memory_space<vmem>>, vector<16x32xf32>,
    } else {
    }
    %c0 = arith.constant 0 : index
    %c0_1 = arith.constant 0 : index
    %3 = vector.load %arg7[%c0, %c0_1] : memref<16x32xf32, #tpu.memory_space<vmem>>, vector<16x32xf32>
    %c0_2 = arith.constant 0 : index
    %c0_3 = arith.constant 0 : index
    %4 = vector.load %arg3[%c0_2, %c0_3] : memref<16x32xf32, #tpu.memory_space<vmem>>, vector<16x32xf32>
    %c0_4 = arith.constant 0 : index
    %c0_5 = arith.constant 0 : index
    %5 = vector.load %arg4[%c0_4, %c0_5] : memref<32x32xf32, #tpu.memory_space<vmem>>, vector<32x32xf32>
    %cst = arith.constant dense<0.000000e+00> : vector<16x32xf32>
    %6 = tpu.matmul %4, %5, %cst {dimension_numbers = #tpu.dot_dimension_numbers<[1], [0], [0], [1], [0, 0, 1, 1], [], []>} : vector<16x32xf32>, vector<32x32xf32>, vector<16x32xf32> -> vector<16x32xf32>
    %7 = arith.addf %3, %6 : vector<16x32xf32>
    %c0_6 = arith.constant 0 : index
    %c0_7 = arith.constant 0 : index
    %8 = vector.load %arg7[%c0_6, %c0_7] : memref<16x32xf32, #tpu.memory_space<vmem>>, vector<16x32xf32>
    tpu.vector_store %arg7[%c0_6, %c0_7], %7 {strides = array<i32>} : memref<16x32xf32, #tpu.memory_space<vmem>>, vector<16x32xf32>,
    %c0_i32_8 = arith.constant 0 : i32
    %9 = arith.cmpi eq, %arg2, %c0_i32_8 : i32
    %10 = arith.extui %9 : i1 to i32
    %c0_i32_9 = arith.constant 0 : i32
    %11 = arith.cmpi ne, %10, %c0_i32_9 : i32
    scf.if %11 {
      %c0_10 = arith.constant 0 : index
      %c0_11 = arith.constant 0 : index
      %12 = vector.load %arg7[%c0_10, %c0_11] : memref<16x32xf32, #tpu.memory_space<vmem>>, vector<16x32xf32>
      %c0_12 = arith.constant 0 : index
      %c0_13 = arith.constant 0 : index
      %13 = vector.load %arg5[%c0_12, %c0_13] : memref<1x32xf32, #tpu.memory_space<vmem>>, vector<1x32xf32>
      %14 = vector.broadcast %13 : vector<1x32xf32> to vector<16x32xf32>
      %15 = arith.addf %12, %14 : vector<16x32xf32>
      %c0_14 = arith.constant 0 : index
      %c0_15 = arith.constant 0 : index
      %16 = vector.load %arg6[%c0_14, %c0_15] : memref<16x32xf32, #tpu.memory_space<vmem>>, vector<16x32xf32>
      tpu.vector_store %arg6[%c0_14, %c0_15], %15 {strides = array<i32>} : memref<16x32xf32, #tpu.memory_space<vmem>>, vector<16x32xf32>,
    } else {
    }
    return
  }
  func.func @transform_0(%arg0: i32, %arg1: i32, %arg2: i32) -> (i32, i32) {
    %c0_i32 = arith.constant 0 : i32
    return %arg0, %arg2 : i32, i32
  }
  func.func @transform_1(%arg0: i32, %arg1: i32, %arg2: i32) -> (i32, i32) {
    %c0_i32 = arith.constant 0 : i32
    return %arg2, %arg1 : i32, i32
  }
  func.func @transform_2(%arg0: i32, %arg1: i32, %arg2: i32) -> (i32, i32) {
    %c0_i32 = arith.constant 0 : i32
    %c0_i32_0 = arith.constant 0 : i32
    return %c0_i32, %arg1 : i32, i32
  }
  func.func @transform_3(%arg0: i32, %arg1: i32, %arg2: i32) -> (i32, i32) {
    %c0_i32 = arith.constant 0 : i32
    return %arg0, %arg1 : i32, i32
  }
}

module attributes {stable_mosaic.version = 11 : i64} {
  func.func @_linear_kernel(%arg0: i32, %arg1: i32, %arg2: i32, %arg3: memref<32x48xf32, #tpu.memory_space<vmem>>, %arg4: memref<48x64xf32, #tpu.memory_space<vmem>>, %arg5: memref<1x64xf32, #tpu.memory_space<vmem>>, %arg6: memref<32x64xf32, #tpu.memory_space<vmem>>, %arg7: memref<32x64xf32, #tpu.memory_space<vmem>>) attributes {dimension_semantics = [#tpu.dimension_semantics<parallel>, #tpu.dimension_semantics<parallel>, #tpu.dimension_semantics<arbitrary>], iteration_bounds = array<i64: 1, 1, 1>, scalar_prefetch = 0 : i64, scratch_operands = 1 : i64, tpu.core_type = #tpu.core_type<tc>, window_params = [{transform_indices = @transform_0, window_bounds = array<i64: 32, 48>}, {transform_indices = @transform_1, window_bounds = array<i64: 48, 64>}, {transform_indices = @transform_2, window_bounds = array<i64: 1, 64>}, {transform_indices = @transform_3, window_bounds = array<i64: 32, 64>}]} {
    %c0_i32 = arith.constant 0 : i32
    %0 = arith.cmpi eq, %arg2, %c0_i32 : i32
    %1 = arith.extui %0 : i1 to i32
    %c0_i32_0 = arith.constant 0 : i32
    %2 = arith.cmpi ne, %1, %c0_i32_0 : i32
    scf.if %2 {
      %cst_10 = arith.constant 0.000000e+00 : f32
      %12 = vector.broadcast %cst_10 : f32 to vector<32x64xf32>
      %c0_11 = arith.constant 0 : index
      %c0_12 = arith.constant 0 : index
      %13 = vector.load %arg7[%c0_11, %c0_12] : memref<32x64xf32, #tpu.memory_space<vmem>>, vector<32x64xf32>
      tpu.vector_store %arg7[%c0_11, %c0_12], %12 {strides = array<i32>} : memref<32x64xf32, #tpu.memory_space<vmem>>, vector<32x64xf32>,
    } else {
    }
    %c0 = arith.constant 0 : index
    %c0_1 = arith.constant 0 : index
    %3 = vector.load %arg7[%c0, %c0_1] : memref<32x64xf32, #tpu.memory_space<vmem>>, vector<32x64xf32>
    %c0_2 = arith.constant 0 : index
    %c0_3 = arith.constant 0 : index
    %4 = vector.load %arg3[%c0_2, %c0_3] : memref<32x48xf32, #tpu.memory_space<vmem>>, vector<32x48xf32>
    %c0_4 = arith.constant 0 : index
    %c0_5 = arith.constant 0 : index
    %5 = vector.load %arg4[%c0_4, %c0_5] : memref<48x64xf32, #tpu.memory_space<vmem>>, vector<48x64xf32>
    %cst = arith.constant dense<0.000000e+00> : vector<32x64xf32>
    %6 = tpu.matmul %4, %5, %cst {dimension_numbers = #tpu.dot_dimension_numbers<[1], [0], [0], [1], [0, 0, 1, 1], [], []>} : vector<32x48xf32>, vector<48x64xf32>, vector<32x64xf32> -> vector<32x64xf32>
    %7 = arith.addf %3, %6 : vector<32x64xf32>
    %c0_6 = arith.constant 0 : index
    %c0_7 = arith.constant 0 : index
    %8 = vector.load %arg7[%c0_6, %c0_7] : memref<32x64xf32, #tpu.memory_space<vmem>>, vector<32x64xf32>
    tpu.vector_store %arg7[%c0_6, %c0_7], %7 {strides = array<i32>} : memref<32x64xf32, #tpu.memory_space<vmem>>, vector<32x64xf32>,
    %c0_i32_8 = arith.constant 0 : i32
    %9 = arith.cmpi eq, %arg2, %c0_i32_8 : i32
    %10 = arith.extui %9 : i1 to i32
    %c0_i32_9 = arith.constant 0 : i32
    %11 = arith.cmpi ne, %10, %c0_i32_9 : i32
    scf.if %11 {
      %c0_10 = arith.constant 0 : index
      %c0_11 = arith.constant 0 : index
      %12 = vector.load %arg7[%c0_10, %c0_11] : memref<32x64xf32, #tpu.memory_space<vmem>>, vector<32x64xf32>
      %c0_12 = arith.constant 0 : index
      %c0_13 = arith.constant 0 : index
      %13 = vector.load %arg5[%c0_12, %c0_13] : memref<1x64xf32, #tpu.memory_space<vmem>>, vector<1x64xf32>
      %14 = vector.broadcast %13 : vector<1x64xf32> to vector<32x64xf32>
      %15 = arith.addf %12, %14 : vector<32x64xf32>
      %c0_14 = arith.constant 0 : index
      %c0_15 = arith.constant 0 : index
      %16 = vector.load %arg6[%c0_14, %c0_15] : memref<32x64xf32, #tpu.memory_space<vmem>>, vector<32x64xf32>
      tpu.vector_store %arg6[%c0_14, %c0_15], %15 {strides = array<i32>} : memref<32x64xf32, #tpu.memory_space<vmem>>, vector<32x64xf32>,
    } else {
    }
    return
  }
  func.func @transform_0(%arg0: i32, %arg1: i32, %arg2: i32) -> (i32, i32) {
    %c0_i32 = arith.constant 0 : i32
    return %arg0, %arg2 : i32, i32
  }
  func.func @transform_1(%arg0: i32, %arg1: i32, %arg2: i32) -> (i32, i32) {
    %c0_i32 = arith.constant 0 : i32
    return %arg2, %arg1 : i32, i32
  }
  func.func @transform_2(%arg0: i32, %arg1: i32, %arg2: i32) -> (i32, i32) {
    %c0_i32 = arith.constant 0 : i32
    %c0_i32_0 = arith.constant 0 : i32
    return %c0_i32, %arg1 : i32, i32
  }
  func.func @transform_3(%arg0: i32, %arg1: i32, %arg2: i32) -> (i32, i32) {
    %c0_i32 = arith.constant 0 : i32
    return %arg0, %arg1 : i32, i32
  }
}

</mosaic_0001>

<bundles_post_ra>
// kernel: cross_attention_forward.5
= control target key start
LH: loop header
LB: loop body
LE: loop exit
PB: predicated region body
PF: predicated region fallthrough
CT: control target
= control target key end

     0   :  { %vm18_vm0 = vcmask 523264   ;;  %v222_v3 = vmov 0.0   ;;  %vm37_vm1 = vcmask 392192   ;;  %s304_s1 = inlined_call_operand.vmem [shape: f32[48,64], index: 1, kind: input, shape index: {}]   ;;  %s305_s0 = inlined_call_operand.vmem [shape: f32[32,48], index: 0, kind: input, shape index: {}]   ;;  %s306_s2 = inlined_call_operand.vmem [shape: f32[1,64], index: 2, kind: input, shape index: {}]   ;;  %s307_s3 = inlined_call_operand.vmem [shape: f32[32,64], index: 3, kind: output, shape index: {}]  }
   0x1   :  { %v31_v0 = vld [vmem:[%s304_s1] sm:$0xff]  ;;  %v32_v1 = vld [vmem:[%s304_s1 + $0x8] sm:$0xff]  ;;  %v33_v2 = vld [vmem:[%s304_s1 + $0x10] sm:$0xff]  ;;  %20 = vst.msk [vmem:[#allocation2 + $0x8] sm:$0xff] %vm18_vm0, %v222_v3 }
   0x2   :  { %19 = vst.msk [vmem:[#allocation2] sm:$0xff] %vm18_vm0, %v222_v3  ;;  %21 = vst.msk [vmem:[#allocation2 + $0x10] sm:$0xff] %vm18_vm0, %v222_v3  ;;  %v203_v4 = vpack.c.bf16 %v32_v1, %v31_v0  ;;  %v34_v5 = vld [vmem:[%s304_s1 + $0x18] sm:$0xff]  ;;  %v35_v7 = vld [vmem:[%s304_s1 + $0x20] sm:$0xff] }
   0x3   :  { %22 = vst.msk [vmem:[#allocation2 + $0x18] sm:$0xff] %vm18_vm0, %v222_v3  ;;  %v207_v6 = vpack.c.bf16 %v34_v5, %v33_v2  ;;  %v36_v8 = vld [vmem:[%s304_s1 + $0x28] sm:$0xff]  ;;  %v27_v9 = vld [vmem:[%s305_s0] sm:$0xff]  ;;  %v29_v10 = vld [vmem:[%s305_s0 + $0x10] sm:$0xff] }
   0x4   :  { %204 = vmatprep.subr.bf16.mxu0 %v203_v4  ;;  %215 = vmatprep.subr.bf16.mxu1 %v203_v4  ;;  %v211_v11 = vpack.c.bf16 %v36_v8, %v35_v7  ;;  %v28_v12 = vld [vmem:[%s305_s0 + $0x8] sm:$0xff]  ;;  %v30_v13 = vld [vmem:[%s305_s0 + $0x18] sm:$0xff]  ;;  %v174_v26 = vld [vmem:[%s306_s2] ss:$0 sm:$0xff] }
   0x5   :  { %206 = vmatpush3.bf16.msra.mxu0 %v203_v4  ;;  %218 = vmatpush3.bf16.msra.mxu1 %v203_v4 }
   0x6   :  { %208 = vmatprep.subr.bf16.mxu0 %v207_v6  ;;  %216 = vmatprep.subr.bf16.mxu1 %v207_v6 }
   0x7   :  { %197 = vmatprep.mubr.msk.f32.mxu0 %vm37_vm1, %v27_v9  ;;  %200 = vmatprep.mubr.msk.f32.mxu1 %vm37_vm1, %v29_v10 }
   0x8   :  { %v24_v14 = vld [vmem:[#allocation2 + $0x8] sm:$0xff] }
   0x9   :  { %210 = vmatpush3.bf16.msra.mxu0 %v207_v6  ;;  %219 = vmatpush3.bf16.msra.mxu1 %v207_v6  ;;  %v23_v16 = vld [vmem:[#allocation2] sm:$0xff]  ;;  %v25_v17 = vld [vmem:[#allocation2 + $0x10] sm:$0xff] }
   0xa   :  { %212 = vmatprep.subr.bf16.mxu0 %v211_v11  ;;  %217 = vmatprep.subr.bf16.mxu1 %v211_v11  ;;  %v26_v15 = vld [vmem:[#allocation2 + $0x18] sm:$0xff] }
   0xd   :  { %214 = vmatpush3.bf16.msra.mxu0 %v211_v11  ;;  %220 = vmatpush3.bf16.msra.mxu1 %v211_v11 }
  0x10   :  { %198 = vmatmul.mubr.msk.f32.vlgmr.msra.gmra.mrb[0].mxu0 %vm37_vm1, %v28_v12  ;;  %201 = vmatmul.mubr.msk.f32.vlgmr.msra.gmra.mrb[0].mxu1 %vm37_vm1, %v30_v13 }
  0xe3   :  { %v199_v18 = vpop.f32.mrb[0].mxu0  ;;  %v202_v19 = vpop.f32.mrb[0].mxu1 }
  0xe4   :  { %v136_v20 = vadd.f32 %v199_v18, %v24_v14  ;;  %v138_v21 = vadd.f32 %v202_v19, %v26_v15  ;;  %v116_v22 = vpop.f32.mrb[1].mxu0  ;;  %v126_v23 = vpop.f32.mrb[1].mxu1 }
  0xe5   :  { %v135_v24 = vadd.f32 %v116_v22, %v23_v16  ;;  %v137_v25 = vadd.f32 %v126_v23, %v25_v17 }
  0xe6   :  { %141 = vst.msk [vmem:[#allocation2 + $0x8] sm:$0xff] %vm18_vm0, %v136_v20  ;;  %143 = vst.msk [vmem:[#allocation2 + $0x18] sm:$0xff] %vm18_vm0, %v138_v21 }
  0xe7   :  { %140 = vst.msk [vmem:[#allocation2] sm:$0xff] %vm18_vm0, %v135_v24  ;;  %142 = vst.msk [vmem:[#allocation2 + $0x10] sm:$0xff] %vm18_vm0, %v137_v25 }
  0xed   :  { %v148_v27 = vld [vmem:[#allocation2 + $0x8] sm:$0xff]  ;;  %v150_v28 = vld [vmem:[#allocation2 + $0x18] sm:$0xff] }
  0xee   :  { %v159_v29 = vadd.f32 %v174_v26, %v148_v27  ;;  %v161_v30 = vadd.f32 %v174_v26, %v150_v28  ;;  %v147_v31 = vld [vmem:[#allocation2] sm:$0xff]  ;;  %v149_v32 = vld [vmem:[#allocation2 + $0x10] sm:$0xff] }
  0xef   :  { %v158_v33 = vadd.f32 %v174_v26, %v147_v31  ;;  %v160_v34 = vadd.f32 %v174_v26, %v149_v32 }
  0xf0   :  { %163 = vst.msk [vmem:[%s307_s3 + $0x8] sm:$0xff] %vm18_vm0, %v159_v29  ;;  %165 = vst.msk [vmem:[%s307_s3 + $0x18] sm:$0xff] %vm18_vm0, %v161_v30 }
  0xf1   :  { %162 = vst.msk [vmem:[%s307_s3] sm:$0xff] %vm18_vm0, %v158_v33  ;;  %164 = vst.msk [vmem:[%s307_s3 + $0x10] sm:$0xff] %vm18_vm0, %v160_v34 }

// kernel: cross_attention_forward.7
= control target key start
LH: loop header
LB: loop body
LE: loop exit
PB: predicated region body
PF: predicated region fallthrough
CT: control target
= control target key end

     0   :  { %vm19_vm0 = vcmask 261120   ;;  %v204_v6 = vmov 0.0   ;;  %s269_s0 = inlined_call_operand.vmem [shape: f32[16,32], index: 0, kind: input, shape index: {}]   ;;  %s270_s1 = inlined_call_operand.vmem [shape: f32[32,32], index: 1, kind: input, shape index: {}]   ;;  %s271_s2 = inlined_call_operand.vmem [shape: f32[1,32], index: 2, kind: input, shape index: {}]   ;;  %s272_s3 = inlined_call_operand.hbm [shape: f32[16,32], index: 3, kind: output, shape index: {}]  }
   0x1   :  { %v26_v0 = vld [vmem:[%s270_s1] sm:$0xff]  ;;  %v27_v1 = vld [vmem:[%s270_s1 + $0x8] sm:$0xff]  ;;  %v28_v2 = vld [vmem:[%s270_s1 + $0x10] sm:$0xff]  ;;  %21 = vst.msk [vmem:[#allocation2 + $0x8] sm:$0xff] %vm19_vm0, %v204_v6 }
   0x2   :  { %v168_v3 = vpack.c.bf16 %v27_v1, %v26_v0  ;;  %v29_v4 = vld [vmem:[%s270_s1 + $0x18] sm:$0xff]  ;;  %v24_v5 = vld [vmem:[%s269_s0] sm:$0xff]  ;;  %20 = vst.msk [vmem:[#allocation2] sm:$0xff] %vm19_vm0, %v204_v6 }
   0x3   :  { %v172_v7 = vpack.c.bf16 %v29_v4, %v28_v2  ;;  %165 = vmatprep.mubr.msk.f32.mxu0 %vm19_vm0, %v24_v5 }
   0x4   :  { %8 = vsyncpa [#allocation4], 0  ;;  %169 = vmatprep.subr.bf16.mxu0 %v168_v3  ;;  %v25_v8 = vld [vmem:[%s269_s0 + $0x8] sm:$0xff]  ;;  %v150_v15 = vld [vmem:[%s271_s2] ss:$0 sm:$0xff]  ;;  %s205_s25 = smov [#allocation3]  }
   0x5   :  { %171 = vmatpush3.bf16.msra.mxu0 %v168_v3  ;;  %s137_s26 = sshll.u32 %s205_s25, 4  ;;  %s138_s26 = int_to_ptr.vmem [resolvable:$true] %s137_s26 }
   0x6   :  { %173 = vmatprep.subr.bf16.mxu0 %v172_v7  ;;  %s180_s0 = scalar_lea.vmem %s138_s26, 256  ;;  %p185_p1 = scmp.lt.s32.totalorder %s138_s26, %s138_s26 }
   0x7   :  { %p181_p0 = scmp.ne.s32.totalorder %s138_s26, %s180_s0  ;;  %p186_p2 = scmp.lt.s32.totalorder %s180_s0, %s180_s0 }
   0x8   :  { %v23_v9 = vld [vmem:[#allocation2 + $0x8] sm:$0xff] }
   0x9   :  { %175 = vmatpush3.bf16.msra.mxu0 %v172_v7  ;;  %v22_v10 = vld [vmem:[#allocation2] sm:$0xff]  ;;  %p187_p3 = por %p186_p2, %p185_p1 }
   0xb   :  { %p188_p4 = pnand %p187_p3, %p181_p0 }
   0xc   :  { %166 = vmatmul.mubr.msk.f32.vlgmr.msra.gmra.mrb[0].mxu0 %vm19_vm0, %v25_v8 }
  0xdf   :  { %v167_v11 = vpop.f32.mrb[0].mxu0 }
  0xe0   :  { %v113_v12 = vadd.f32 %v167_v11, %v23_v9  ;;  %v103_v13 = vpop.f32.mrb[1].mxu0 }
  0xe1   :  { %v112_v14 = vadd.f32 %v103_v13, %v22_v10 }
  0xe2   :  { %115 = vst.msk [vmem:[#allocation2 + $0x8] sm:$0xff] %vm19_vm0, %v113_v12 }
  0xe3   :  { %114 = vst.msk [vmem:[#allocation2] sm:$0xff] %vm19_vm0, %v112_v14 }
  0xe9   :  { %v120_v16 = vld [vmem:[#allocation2 + $0x8] sm:$0xff] }
  0xea   :  { %v119_v17 = vld [vmem:[#allocation2] sm:$0xff]  ;;  %v129_v18 = vadd.f32 %v150_v15, %v120_v16 }
  0xeb   :  { %v128_v19 = vadd.f32 %v150_v15, %v119_v17 }
  0xec   :  { %131 = vst.msk [vmem:[#allocation3 + $0x8] sm:$0xff] %vm19_vm0, %v129_v18 }
  0xed   :  { %130 = vst.msk [vmem:[#allocation3] sm:$0xff] %vm19_vm0, %v128_v19 }
  0xee   :  { %191 = shalt.err (!%p188_p4)
}
  0xef   :  { %s192_s28 = scalar_lea.hbm %s272_s3, 256 }
  0xf0   :  { %p193_p5 = scmp.ne.s32.totalorder %s272_s3, %s192_s28  ;;  %p196_p6 = scmp.lt.u32.totalorder %s192_s28, %s272_s3 }
  0xf2   :  { %p198_p7 = pnand %p196_p6, %p193_p5 }
  0xf4   :  { %201 = shalt.err (!%p198_p7)
}
  0xf5   :  { %s206_s6 = smov 128   ;;  %s207_s7 = smov 8  }
  0xf6   :  { %143 = dma.vmem_to_hbm [thread:$0]  %s138_s26, 256, %s272_s3, [#allocation4], %s206_s6, %s206_s6, %s207_s7  }
  0xf7   :  { %202 = dma.done.wait [#allocation4], 256  }
  0xf8   :  { %203 = vsyncadd [#allocation4], 4294967040 }
  0xf9   :  { %147 = vsyncpa [#allocation4], 1 }

// kernel: cross_attention_forward.4
= control target key start
LH: loop header
LB: loop body
LE: loop exit
PB: predicated region body
PF: predicated region fallthrough
CT: control target
= control target key end

     0   :  { %8 = vsyncpa [#allocation4], 0  ;;  %s313_s0 = inlined_call_operand.vmem [shape: f32[16,32], index: 0, kind: input, shape index: {}]   ;;  %s314_s1 = inlined_call_operand.hbm [shape: f32[32,32], index: 1, kind: input, shape index: {}]   ;;  %s315_s2 = inlined_call_operand.hbm [shape: f32[1,32], index: 2, kind: input, shape index: {}]   ;;  %s316_s3 = inlined_call_operand.vmem [shape: f32[16,32], index: 3, kind: output, shape index: {}]  }
   0x1   :  { %9 = vsyncpa [#allocation6], 0  ;;  %s244_s12 = smov [#allocation3]   ;;  %s196_s16 = scalar_lea.hbm %s314_s1, 512 }
   0x2   :  { %s17_s13 = sshll.u32 %s244_s12, 4  ;;  %p197_p0 = scmp.ne.s32.totalorder %s314_s1, %s196_s16  ;;  %s18_s13 = int_to_ptr.vmem [resolvable:$true] %s17_s13 }
   0x3   :  { %p200_p1 = scmp.lt.u32.totalorder %s196_s16, %s314_s1 }
   0x5   :  { %p202_p2 = pnand %p200_p1, %p197_p0 }
   0x7   :  { %205 = shalt.err (!%p202_p2)
}
   0x8   :  { %s206_s21 = scalar_lea.vmem %s18_s13, 512  ;;  %p211_p4 = scmp.lt.s32.totalorder %s18_s13, %s18_s13 }
   0x9   :  { %p207_p3 = scmp.ne.s32.totalorder %s18_s13, %s206_s21  ;;  %p212_p5 = scmp.lt.s32.totalorder %s206_s21, %s206_s21 }
   0xb   :  { %p213_p6 = por %p212_p5, %p211_p4 }
   0xd   :  { %p214_p7 = pnand %p213_p6, %p207_p3 }
   0xf   :  { %217 = shalt.err (!%p214_p7)
}
  0x10   :  { %s245_s22 = smov 128   ;;  %s246_s23 = smov 8  }
  0x11   :  { %23 = dma.hbm_to_vmem [thread:$0]  %s314_s1, 512, %s18_s13, [#allocation4], %s245_s22, %s245_s22, %s246_s23  }
  0x12   :  { %s247_s26 = smov [#allocation5]   ;;  %s218_s30 = scalar_lea.hbm %s315_s2, 16 }
  0x13   :  { %s30_s27 = sshll.u32 %s247_s26, 4  ;;  %p219_p8 = scmp.ne.s32.totalorder %s315_s2, %s218_s30  ;;  %s31_s27 = int_to_ptr.vmem [resolvable:$true] %s30_s27 }
  0x14   :  { %p222_p9 = scmp.lt.u32.totalorder %s218_s30, %s315_s2 }
  0x16   :  { %p224_p10 = pnand %p222_p9, %p219_p8 }
  0x18   :  { %227 = shalt.err (!%p224_p10)
}
  0x19   :  { %s228_s8 = scalar_lea.vmem %s31_s27, 16  ;;  %s232_s1 = scalar_lea.vmem %s31_s27, 32 }
  0x1a   :  { %p229_p11 = scmp.ne.s32.totalorder %s31_s27, %s228_s8  ;;  %p233_p12 = scmp.lt.s32.totalorder %s31_s27, %s31_s27 }
  0x1b   :  { %p234_p13 = scmp.lt.s32.totalorder %s232_s1, %s228_s8 }
  0x1d   :  { %p235_p0 = por %p234_p13, %p233_p12 }
  0x1f   :  { %p236_p1 = pnand %p235_p0, %p229_p11 }
  0x21   :  { %239 = shalt.err (!%p236_p1)
}
  0x22   :  { %33 = dma.hbm_to_vmem [thread:$0]  %s315_s2, 16, %s31_s27, [#allocation6]  }
  0x23   :  { %240 = dma.done.wait [#allocation4], 512  }
  0x24   :  { %241 = vsyncadd [#allocation4], 4294966784 }
  0x25   :  { %242 = dma.done.wait [#allocation6], 16  }
  0x26   :  { %243 = vsyncadd [#allocation6], 4294967280  ;;  %vm44_vm0 = vcmask 261120   ;;  %v248_v0 = vmov 0.0   ;;  %v51_v1 = vld [vmem:[#allocation3] sm:$0xff]  ;;  %v52_v2 = vld [vmem:[#allocation3 + $0x8] sm:$0xff] }
  0x27   :  { %46 = vst.msk [vmem:[#allocation2 + $0x8] sm:$0xff] %vm44_vm0, %v248_v0  ;;  %45 = vst.msk [vmem:[#allocation2] sm:$0xff] %vm44_vm0, %v248_v0  ;;  %v53_v3 = vld [vmem:[#allocation3 + $0x10] sm:$0xff]  ;;  %v183_v4 = vpack.c.bf16 %v52_v2, %v51_v1  ;;  %v54_v5 = vld [vmem:[#allocation3 + $0x18] sm:$0xff] }
  0x28   :  { %v49_v6 = vld [vmem:[%s313_s0] sm:$0xff]  ;;  %v187_v7 = vpack.c.bf16 %v54_v5, %v53_v3  ;;  %v50_v8 = vld [vmem:[%s313_s0 + $0x8] sm:$0xff]  ;;  %v165_v15 = vld [vmem:[#allocation5] ss:$0 sm:$0xff] }
  0x29   :  { %180 = vmatprep.mubr.msk.f32.mxu0 %vm44_vm0, %v49_v6  ;;  %184 = vmatprep.subr.bf16.mxu0 %v183_v4 }
  0x2a   :  { %186 = vmatpush3.bf16.msra.mxu0 %v183_v4 }
  0x2b   :  { %188 = vmatprep.subr.bf16.mxu0 %v187_v7 }
  0x2e   :  { %190 = vmatpush3.bf16.msra.mxu0 %v187_v7  ;;  %v48_v9 = vld [vmem:[#allocation2 + $0x8] sm:$0xff]  ;;  %v47_v10 = vld [vmem:[#allocation2] sm:$0xff] }
  0x31   :  { %181 = vmatmul.mubr.msk.f32.vlgmr.msra.gmra.mrb[0].mxu0 %vm44_vm0, %v50_v8 }
 0x104   :  { %v182_v11 = vpop.f32.mrb[0].mxu0 }
 0x105   :  { %v138_v12 = vadd.f32 %v182_v11, %v48_v9  ;;  %v128_v13 = vpop.f32.mrb[1].mxu0 }
 0x106   :  { %v137_v14 = vadd.f32 %v128_v13, %v47_v10 }
 0x107   :  { %140 = vst.msk [vmem:[#allocation2 + $0x8] sm:$0xff] %vm44_vm0, %v138_v12 }
 0x108   :  { %139 = vst.msk [vmem:[#allocation2] sm:$0xff] %vm44_vm0, %v137_v14 }
 0x10e   :  { %v145_v16 = vld [vmem:[#allocation2 + $0x8] sm:$0xff] }
 0x10f   :  { %v154_v17 = vadd.f32 %v165_v15, %v145_v16  ;;  %v144_v18 = vld [vmem:[#allocation2] sm:$0xff] }
 0x110   :  { %v153_v19 = vadd.f32 %v165_v15, %v144_v18 }
 0x111   :  { %156 = vst.msk [vmem:[%s316_s3 + $0x8] sm:$0xff] %vm44_vm0, %v154_v17 }
 0x112   :  { %155 = vst.msk [vmem:[%s316_s3] sm:$0xff] %vm44_vm0, %v153_v19 }
 0x113   :  { %161 = vsyncpa [#allocation4], 1 }
 0x114   :  { %162 = vsyncpa [#allocation6], 1 }

// kernel: cross_attention_forward.6
= control target key start
LH: loop header
LB: loop body
LE: loop exit
PB: predicated region body
PF: predicated region fallthrough
CT: control target
= control target key end

     0   :  { %s1453_s9 = smov 0   ;;  %s1455_s10 = smov 0   ;;  %s1652_s0 = inlined_call_operand.vmem [shape: f32[2,8,32], index: 0, kind: input, shape index: {}]   ;;  %s1653_s1 = inlined_call_operand.vmem [shape: f32[2,16,64], index: 1, kind: input, shape index: {}]   ;;  %s1654_s2 = inlined_call_operand.vmem [shape: f32[2,8,32], index: 2, kind: output, shape index: {}]  }
   0x1   :  { %s1457_s11 = smov 0  }
   0x2 LB: > { %s31_s12 = sadd.s32 1, %s1414_s10  ;;  %p1156_p0 = scmp.ge.s32.totalorder %s1418_s11, 1  ;;  %s1418_s11 = sphi %s1457_s11, %s12_s11   ;;  %s1414_s10 = sphi %s1455_s10, %s1658_s10   ;;  %s1410_s9 = sphi %s1453_s9, %s1657_s9  }
   0x3   : > { %p33_p1 = scmp.ge.s32.totalorder %s31_s12, 2  ;;  %p154_p2 = scmp.lt.s32.totalorder %s1418_s11, 3 }
   0x5   : > { %s1660_s12 = smov (%p33_p1, %s31_s12), 0  ;;  %p155_p3 = pnand %p1156_p0, %p154_p2 }
   0x6   : > { %p189_p4 = scmp.lt.s32.totalorder (!%p155_p3), %s1410_s9, 1  ;;  %v1420_v0 = vmov (!%p155_p3), 0.0|0.0   ;;  %vm1421_vm0 = vmmov (!%p155_p3), 0   ;;  %v1422_v1 = vmov (!%p155_p3), 0.0   ;;  %vm225_vm1 = vcmask (!%p155_p3), 64512   ;;  %s1425_s21 = smov (!%p155_p3), 96  }
   0x7   : > { %158 = sbr.rel (%p155_p3) target bundleno = 2437 (0x985), region = 28  ;;  %1260 = vmatprep.subr.bf16.mxu0 (!%p155_p3), %v1420_v0  ;;  %1208 = vmatprep.mubr.msk.f32.mxu0 (!%p155_p3), %vm1421_vm0, %v1422_v1  ;;  %vm1485_vm2 = vmpackc.low (!%p155_p3), %vm225_vm1, %vm225_vm1  ;;  %vm217_vm3 = vcmask (!%p155_p3), 31744   ;;  %v1423_v7 = vmov (!%p155_p3), -1e+30   ;;  %vm307_vm4 = vcmask (!%p155_p3), 130048   ;;  %v1424_v11 = vmov (!%p155_p3), 0  }
   0x8   : > { %1264 = vmatprep.subr.bf16.mxu1 (!%p155_p3), %v1420_v0  ;;  %1215 = vmatprep.mubr.msk.f32.mxu1 (!%p155_p3), %vm1421_vm0, %v1422_v1  ;;  %218 = vst.msk [vmem:[#allocation2] sm:$0xff] (!%p155_p3), %vm217_vm3, %v1423_v7  ;;  %219 = vst.msk [vmem:[#allocation3] sm:$0xff] (!%p155_p3), %vm217_vm3, %v1422_v1  ;;  %s1426_s22 = smov (!%p155_p3), 120   ;;  %vm328_vm5 = vcmask (!%p155_p3), 7168   ;;  %v1427_v35 = vmov (!%p155_p3), 1   ;;  %s1428_s23 = smov (!%p155_p3), 88  }
   0x9   : > { %1330 = vset.pattern.permute.xlu0 (!%p155_p3), %v1424_v11  ;;  %vm523_vm6 = vcmask (!%p155_p3), 15368   ;;  %s1429_s24 = smov (!%p155_p3), 112   ;;  %v1430_v58 = vmov (!%p155_p3), 2   ;;  %vm723_vm7 = vcmask (!%p155_p3), 23568   ;;  %s1431_s25 = smov (!%p155_p3), 80   ;;  %vm923_vm8 = vcmask (!%p155_p3), 31768  }
   0xa   : > { %1352 = vset.pattern.permute.xlu1 (!%p155_p3), %v1430_v58  ;;  %s1432_s26 = smov (!%p155_p3), 104   ;;  %s1434_s27 = smov (!%p155_p3), 72   ;;  %vm220_vm9 = vcmask (!%p155_p3), 261120   ;;  %vm616_vm10 = vcmask (!%p155_p3), 130112   ;;  %vm816_vm11 = vcmask (!%p155_p3), 195712   ;;  %vm1016_vm12 = vcmask (!%p155_p3), 261312  }
   0xb   : > { %221 = vst.msk [vmem:[#allocation4] sm:$0xff] (!%p155_p3), %vm220_vm9, %v1422_v1  ;;  %s1435_s28 = smov (!%p155_p3), 8   ;;  %s1436_s29 = smov (!%p155_p3), 16  }
   0xc   : > { %s1437_s30 = smov (!%p155_p3), 24  }
   0xe   : > { %s1662_s9 = smov (!%p189_p4, %s1410_s9), 1 }
   0xf   : > { %s1179_s13 = sshll.u32 %s1662_s9, 4  ;;  %s1157_s17 = sshll.u32 %s1662_s9, 3  ;;  %v1512_v13 = vld [vmem:[#allocation2] sm:$0xff] }
  0x10   : > { %s204_s16 = scalar_lea.vmem %s1653_s1, %s1179_s13  ;;  %s195_s20 = scalar_lea.vmem %s1652_s0, %s1157_s17 }
  0x11   : > { %v223_v2 = vld [vmem:[%s204_s16] sm:$0xff]  ;;  %v224_v3 = vld [vmem:[%s204_s16 + $0x8] sm:$0xff]  ;;  %s212_s5 = scalar_lea.vmem %s1654_s2, %s1157_s17 }
  0x12   : > { %v1261_v5 = vpack.c.bf16 %v224_v3, %v223_v2  ;;  %v1498_v6 = vld [vmem:[%s195_s20] sm:$0xff]  ;;  %v1507_v12 = vpack.i.bf16 %v224_v3, %v223_v2 }
  0x14   : > { %1263 = vmatpush3.bf16.xpose.msk.msra.mxu0 %vm1485_vm2, %v1261_v5  ;;  %1332 = vrot.lane.b32.xlu1 %v1507_v12, %s1425_s21 }
  0x15   : > { %1271 = vmatprep.subr.bf16.mxu0 %v1420_v0 }
  0x18   : > { %1337 = vrot.lane.b32.xlu1 %v1507_v12, %s1426_s22 }
  0x1b   : > { %1209 = vmatmul.mubr.msk.f32.vlgmr.msra.gmra.mrb[0].mxu0 %vm225_vm1, %v1498_v6 }
  0x1c   : > { %1229 = vmatprep.mubr.msk.f32.mxu0 %vm1421_vm0, %v1422_v1  ;;  %419 = vrot.lane.b32.xlu1 %v1498_v6, %s1426_s22 }
  0x86   : > { %v1333_v17 = vpop.permute.xlu1 %1332 }
  0x87   : > { %v1335_v18 = vunpack.i.h.bf16 %v1333_v17  ;;  %v1334_v19 = vunpack.i.l.bf16 %v1333_v17 }
  0x89   : > { %v1265_v20 = vpack.c.bf16 %v1335_v18, %v1334_v19 }
  0x8a   : > { %v1338_v24 = vpop.permute.xlu1 %1337 }
  0x8b   : > { %1266 = vmatpush3.bf16.msra.mxu1 %v1265_v20  ;;  %v1340_v25 = vunpack.i.h.bf16 %v1338_v24  ;;  %v1339_v26 = vunpack.i.l.bf16 %v1338_v24  ;;  %v1433_v24 = vmov 3  }
  0x8c   : > { %1267 = vmatprep.subr.bf16.mxu1 %v1420_v0 }
  0x8d   : > { %v1268_v27 = vpack.c.bf16 %v1340_v25, %v1339_v26 }
  0x8e   : > { %v420_v29 = vpop.permute.xlu1 %419 }
  0xee   : > { %v301_v8 = vpop.f32.mrb[0].mxu0 }
  0xef   : > { %v1210_v9 = vpop.f32.mrb[1].mxu0  ;;  %v308_v10 = vsel %vm307_vm4, %v301_v8, -inf }
  0xf0   : > { %309 = vmax.xlane.f32.xlu0 %v308_v10 }
 0x17d   : > { %v310_v14 = vpop.xlane.xlu0 %309 }
 0x17e   : > { %v1515_v15 = vmax.f32 %v1512_v13, %v310_v14 }
 0x180   : > { %v312_v16 = vsub.f32 %v1512_v13, %v1515_v15  ;;  %418 = vst.msk [vmem:[#allocation2] sm:$0xff] %vm328_vm5, %v1515_v15  ;;  %317 = vperm.xlu0 %1330, %v1515_v15  }
 0x184   : > { %1341 = vset.pattern.permute.xlu0 %v1427_v35 }
 0x187   : > { %v1540_v37 = vld [vmem:[#allocation2] sm:$0xff] }
 0x1ff   : > { %v318_v21 = vpop.permute.xlu0 %317 }
 0x200   : > { %v320_v22 = vsub.f32 %v301_v8, %v318_v21 }
 0x202   : > { %v321_v23 = vmul.f32 1.442695, %v320_v22 }
 0x204   : > { %1378 = vpow2.f32 %v321_v23 }
 0x20e   : > { %v1523_v28 = vpop.eup %1378 }
 0x20f   : > { %1216 = vmatmul.mubr.msk.f32.vlgmr.msra.gmra.mrb[0].mxu1 %vm307_vm4, %v1523_v28  ;;  %v324_v4 = vsel %vm307_vm4, %v1523_v28, 0.0  ;;  %v313_v28 = vmul.f32 1.442695, %v312_v16 }
 0x210   : > { %1270 = vmatpush3.bf16.xpose.msk.msra.mxu1 %vm1485_vm2, %v1268_v27  ;;  %1222 = vmatprep.mubr.msk.f32.mxu1 %vm1421_vm0, %v1422_v1 }
 0x211   : > { %1278 = vmatprep.subr.bf16.mxu1 %v1420_v0 }
 0x217   : > { %1223 = vmatmul.mubr.msk.f32.vlgmr.msra.gmra.mrb[2].mxu1 %vm225_vm1, %v420_v29 }
 0x218   : > { %1243 = vmatprep.mubr.msk.f32.mxu1 %vm1421_vm0, %v1422_v1 }
 0x2e2   : > { %v1535_v30 = vpop.f32.mrb[0].mxu1 }
 0x2e3   : > { %v1217_v31 = vpop.f32.mrb[1].mxu1 }
 0x2ea   : > { %v497_v32 = vpop.f32.mrb[2].mxu1 }
 0x2eb   : > { %v1224_v33 = vpop.f32.mrb[3].mxu1  ;;  %v503_v34 = vsel %vm307_vm4, %v497_v32, -inf }
 0x2ec   : > { %504 = vmax.xlane.f32.xlu1 %v503_v34 }
 0x2fd   : > { %1343 = vrot.lane.b32.xlu1 %v1507_v12, %s1428_s23 }
 0x379   : > { %v505_v36 = vpop.xlane.xlu1 %504 }
 0x37a   : > { %v1543_v38 = vmax.f32 %v1540_v37, %v505_v36 }
 0x37c   : > { %v507_v39 = vsub.f32 %v1540_v37, %v1543_v38  ;;  %618 = vst.msk [vmem:[#allocation2] sm:$0xff] %vm523_vm6, %v1543_v38  ;;  %512 = vperm.xlu0 %1341, %v1543_v38  }
 0x37d   : > { %v1344_v40 = vpop.permute.xlu1 %1343 }
 0x37e   : > { %v1346_v41 = vunpack.i.h.bf16 %v1344_v40  ;;  %v1345_v42 = vunpack.i.l.bf16 %v1344_v40 }
 0x380   : > { %1348 = vrot.lane.b32.xlu0 %v1507_v12, %s1429_s24  ;;  %v1272_v43 = vpack.c.bf16 %v1346_v41, %v1345_v42  ;;  %v306_v41 = vld [vmem:[#allocation3] sm:$0xff] }
 0x381   : > { %1363 = vset.pattern.permute.xlu0 %v1433_v24 }
 0x382   : > { %1273 = vmatpush3.bf16.msra.mxu0 %v1272_v43 }
 0x383   : > { %1274 = vmatprep.subr.bf16.mxu0 %v1420_v0  ;;  %v1569_v59 = vld [vmem:[#allocation2] sm:$0xff] }
 0x384   : > { %619 = vrot.lane.b32.xlu0 %v1498_v6, %s1429_s24 }
 0x3fb   : > { %v513_v44 = vpop.permute.xlu0 %512 }
 0x3fc   : > { %v515_v45 = vsub.f32 %v497_v32, %v513_v44 }
 0x3fe   : > { %v516_v46 = vmul.f32 1.442695, %v515_v45 }
 0x3ff   : > { %v1349_v47 = vpop.permute.xlu0 %1348 }
 0x400   : > { %1380 = vpow2.f32 %v516_v46  ;;  %v1351_v48 = vunpack.i.h.bf16 %v1349_v47  ;;  %v1350_v49 = vunpack.i.l.bf16 %v1349_v47 }
 0x402   : > { %v1275_v50 = vpack.c.bf16 %v1351_v48, %v1350_v49 }
 0x403   : > { %v620_v52 = vpop.permute.xlu0 %619 }
 0x40a   : > { %v1553_v51 = vpop.eup %1380 }
 0x40b   : > { %1230 = vmatmul.mubr.msk.f32.vlgmr.msra.gmra.mrb[2].mxu0 %vm307_vm4, %v1553_v51 }
 0x40c   : > { %1277 = vmatpush3.bf16.xpose.msk.msra.mxu0 %vm1485_vm2, %v1275_v50  ;;  %1236 = vmatprep.mubr.msk.f32.mxu0 %vm1421_vm0, %v1422_v1 }
 0x40d   : > { %1285 = vmatprep.subr.bf16.mxu0 %v1420_v0 }
 0x413   : > { %1237 = vmatmul.mubr.msk.f32.vlgmr.msra.gmra.mrb[4].mxu0 %vm225_vm1, %v620_v52 }
 0x414   : > { %1257 = vmatprep.mubr.msk.f32.mxu0 %vm1421_vm0, %v1422_v1 }
 0x4de   : > { %v1565_v53 = vpop.f32.mrb[2].mxu0 }
 0x4df   : > { %v1231_v54 = vpop.f32.mrb[3].mxu0 }
 0x4e6   : > { %v697_v55 = vpop.f32.mrb[4].mxu0 }
 0x4e7   : > { %v1238_v56 = vpop.f32.mrb[5].mxu0  ;;  %v703_v57 = vsel %vm307_vm4, %v697_v55, -inf }
 0x4e8   : > { %704 = vmax.xlane.f32.xlu0 %v703_v57 }
 0x575   : > { %v705_v60 = vpop.xlane.xlu0 %704 }
 0x576   : > { %v1572_v61 = vmax.f32 %v1569_v59, %v705_v60 }
 0x578   : > { %v707_v62 = vsub.f32 %v1569_v59, %v1572_v61  ;;  %818 = vst.msk [vmem:[#allocation2] sm:$0xff] %vm723_vm7, %v1572_v61  ;;  %712 = vperm.xlu1 %1352, %v1572_v61  }
 0x57a   : > { %v708_v47 = vmul.f32 1.442695, %v707_v62 }
 0x57c   : > { %1354 = vrot.lane.b32.xlu1 %v1507_v12, %s1431_s25 }
 0x57d   : > { %1370 = vset.pattern.permute.xlu1 %v1427_v35 }
 0x57f   : > { %v901_v26 = vld [vmem:[#allocation2] sm:$0xff] }
 0x580   : > { %1359 = vrot.lane.b32.xlu1 %v1507_v12, %s1432_s26 }
 0x584   : > { %819 = vrot.lane.b32.xlu1 %v1498_v6, %s1432_s26 }
 0x5f7   : > { %v713_v63 = vpop.permute.xlu1 %712 }
 0x5f8   : > { %v715_v2 = vsub.f32 %v697_v55, %v713_v63  ;;  %v409_v55 = vld [vmem:[#allocation4] sm:$0xff] }
 0x5fa   : > { %v716_v3 = vmul.f32 1.442695, %v715_v2 }
 0x5fb   : > { %v1355_v5 = vpop.permute.xlu1 %1354 }
 0x5fc   : > { %1382 = vpow2.f32 %v716_v3  ;;  %v1357_v7 = vunpack.i.h.bf16 %v1355_v5  ;;  %v1356_v8 = vunpack.i.l.bf16 %v1355_v5 }
 0x5fd   : > { %1384 = vpow2.f32 %v313_v28 }
 0x5fe   : > { %v1279_v9 = vpack.c.bf16 %v1357_v7, %v1356_v8 }
 0x5ff   : > { %v1360_v10 = vpop.permute.xlu1 %1359 }
 0x600   : > { %1280 = vmatpush3.bf16.msra.mxu1 %v1279_v9  ;;  %v1362_v14 = vunpack.i.h.bf16 %v1360_v10  ;;  %v1361_v17 = vunpack.i.l.bf16 %v1360_v10 }
 0x601   : > { %1281 = vmatprep.subr.bf16.mxu1 %v1420_v0 }
 0x602   : > { %v1282_v18 = vpack.c.bf16 %v1362_v14, %v1361_v17 }
 0x603   : > { %v820_v6 = vpop.permute.xlu1 %819 }
 0x606   : > { %v1383_v19 = vpop.eup %1382 }
 0x607   : > { %1244 = vmatmul.mubr.msk.f32.vlgmr.msra.gmra.mrb[4].mxu1 %vm307_vm4, %v1383_v19  ;;  %v719_v36 = vsel %vm307_vm4, %v1383_v19, 0.0  ;;  %v1385_v40 = vpop.eup %1384 }
 0x608   : > { %1250 = vmatprep.mubr.msk.f32.mxu1 %vm1421_vm0, %v1422_v1  ;;  %v323_v42 = vmul.f32 %v1385_v40, %v306_v41  ;;  %v508_v1 = vmul.f32 1.442695, %v507_v39 }
 0x609   : > { %1284 = vmatpush3.bf16.xpose.msk.msra.mxu1 %vm1485_vm2, %v1282_v18 }
 0x610   : > { %1251 = vmatmul.mubr.msk.f32.vlgmr.msra.gmra.mrb[6].mxu1 %vm225_vm1, %v820_v6 }
 0x6da   : > { %v1590_v20 = vpop.f32.mrb[4].mxu1 }
 0x6db   : > { %v1245_v21 = vpop.f32.mrb[5].mxu1 }
 0x6e3   : > { %v897_v22 = vpop.f32.mrb[6].mxu1 }
 0x6e4   : > { %v1252_v23 = vpop.f32.mrb[7].mxu1  ;;  %v903_v0 = vsel %vm307_vm4, %v897_v22, -inf }
 0x6e5   : > { %904 = vmax.xlane.f32.xlu1 %v903_v0 }
 0x6f6   : > { %1365 = vrot.lane.b32.xlu1 %v1507_v12, %s1434_s27  ;;  %v519_v12 = vsel %vm307_vm4, %v1553_v51, 0.0 }
 0x71a   : > { %325 = vadd.xlane.f32.xlu1 %v324_v4 }
 0x772   : > { %v905_v25 = vpop.xlane.xlu1 %904 }
 0x773   : > { %v906_v27 = vmax.f32 %v901_v26, %v905_v25 }
 0x775   : > { %v907_v29 = vsub.f32 %v901_v26, %v906_v27  ;;  %1018 = vst.msk [vmem:[#allocation2] sm:$0xff] %vm923_vm8, %v906_v27  ;;  %912 = vperm.xlu0 %1363, %v906_v27  }
 0x776   : > { %v1366_v31 = vpop.permute.xlu1 %1365 }
 0x777   : > { %v1368_v32 = vunpack.i.h.bf16 %v1366_v31  ;;  %v1367_v33 = vunpack.i.l.bf16 %v1366_v31  ;;  %v908_v49 = vmul.f32 1.442695, %v907_v29 }
 0x779   : > { %v1286_v34 = vpack.c.bf16 %v1368_v32, %v1367_v33  ;;  %1369 = vset.pattern.permute.xlu0 %v1424_v11 }
 0x77b   : > { %1287 = vmatpush3.bf16.msra.mxu0 %v1286_v34 }
 0x794   : > { %520 = vadd.xlane.f32.xlu0 %v519_v12 }
 0x798   : > { %720 = vadd.xlane.f32.xlu0 %v719_v36 }
 0x7a7   : > { %v326_v43 = vpop.xlane.xlu1 %325 }
 0x7a8   : > { %v327_v44 = vadd.f32 %v326_v43, %v323_v42 }
 0x7aa   : > { %329 = vst.msk [vmem:[#allocation3] sm:$0xff] %vm328_vm5, %v327_v44 }
 0x7ae   : > { %412 = vperm.xlu0 %1369, %v1385_v40  }
 0x7b1   : > { %v502_v51 = vld [vmem:[#allocation3] sm:$0xff] }
 0x7b2   : > { %1375 = vset.pattern.permute.xlu0 %v1430_v58 }
 0x7f4   : > { %v913_v13 = vpop.permute.xlu0 %912 }
 0x7f5   : > { %v915_v15 = vsub.f32 %v897_v22, %v913_v13 }
 0x7f7   : > { %v916_v16 = vmul.f32 1.442695, %v915_v15 }
 0x7f9   : > { %1386 = vpow2.f32 %v916_v16 }
 0x7fa   : > { %1388 = vpow2.f32 %v508_v1 }
 0x7fb   : > { %1390 = vpow2.f32 %v708_v47 }
 0x7fc   : > { %1392 = vpow2.f32 %v908_v49 }
 0x803   : > { %v1387_v45 = vpop.eup %1386 }
 0x804   : > { %1258 = vmatmul.mubr.msk.f32.vlgmr.msra.gmra.mrb[6].mxu0 %vm307_vm4, %v1387_v45  ;;  %v919_v46 = vsel %vm307_vm4, %v1387_v45, 0.0  ;;  %v1389_v48 = vpop.eup %1388 }
 0x805   : > { %920 = vadd.xlane.f32.xlu1 %v919_v46  ;;  %v1391_v50 = vpop.eup %1390  ;;  %v518_v37 = vmul.f32 %v1389_v48, %v502_v51 }
 0x806   : > { %v1393_v52 = vpop.eup %1392 }
 0x816   : > { %607 = vperm.xlu1 %1370, %v1389_v48  }
 0x81a   : > { %612 = vrot.lane.b32.xlu1 %v1565_v53, %s1435_s28 }
 0x81b   : > { %1371 = vset.pattern.permute.xlu1 %v1430_v58 }
 0x81e   : > { %807 = vperm.xlu1 %1371, %v1391_v50  }
 0x821   : > { %v521_v38 = vpop.xlane.xlu0 %520 }
 0x822   : > { %v522_v39 = vadd.f32 %v521_v38, %v518_v37  ;;  %812 = vrot.lane.b32.xlu1 %v1590_v20, %s1436_s29 }
 0x823   : > { %1372 = vset.pattern.permute.xlu1 %v1433_v24 }
 0x824   : > { %524 = vst.msk [vmem:[#allocation3] sm:$0xff] %vm523_vm6, %v522_v39 }
 0x825   : > { %v721_v54 = vpop.xlane.xlu0 %720 }
 0x826   : > { %1007 = vperm.xlu1 %1372, %v1393_v52  }
 0x82a   : > { %1373 = vset.pattern.permute.xlu1 %v1424_v11 }
 0x82b   : > { %v702_v53 = vld [vmem:[#allocation3] sm:$0xff] }
 0x82c   : > { %v718_v56 = vmul.f32 %v1391_v50, %v702_v53 }
 0x82d   : > { %v413_v57 = vpop.permute.xlu0 %412 }
 0x82e   : > { %v722_v58 = vadd.f32 %v721_v54, %v718_v56  ;;  %v415_v59 = vmul.f32 %v413_v57, %v409_v55 }
 0x830   : > { %724 = vst.msk [vmem:[#allocation3] sm:$0xff] %vm723_vm7, %v722_v58  ;;  %v416_v60 = vadd.f32 %v415_v59, %v1535_v30 }
 0x832   : > { %417 = vst.msk [vmem:[#allocation4] sm:$0xff] %vm225_vm1, %v416_v60 }
 0x837   : > { %v902_v61 = vld [vmem:[#allocation3] sm:$0xff] }
 0x838   : > { %v918_v62 = vmul.f32 %v1393_v52, %v902_v61 }
 0x839   : > { %v604_v11 = vld [vmem:[#allocation4] sm:$0xff] }
 0x892   : > { %v921_v63 = vpop.xlane.xlu1 %920 }
 0x893   : > { %v922_v2 = vadd.f32 %v921_v63, %v918_v62 }
 0x895   : > { %924 = vst.msk [vmem:[#allocation3] sm:$0xff] %vm923_vm8, %v922_v2 }
 0x896   : > { %v608_v3 = vpop.permute.xlu1 %607 }
 0x897   : > { %v610_v5 = vmul.f32 %v608_v3, %v604_v11 }
 0x89a   : > { %v613_v7 = vpop.permute.xlu1 %612 }
 0x89b   : > { %v615_v8 = vadd.f32 %v613_v7, %v610_v5 }
 0x89c   : > { %v1022_v9 = vld [vmem:[#allocation3] sm:$0xff] }
 0x89d   : > { %1394 = vrcp.f32 %v1022_v9  ;;  %617 = vst.msk [vmem:[#allocation4] sm:$0xff] %vm616_vm10, %v615_v8 }
 0x89e   : > { %v808_v10 = vpop.permute.xlu1 %807 }
 0x8a2   : > { %v813_v17 = vpop.permute.xlu1 %812 }
 0x8a4   : > { %v804_v30 = vld [vmem:[#allocation4] sm:$0xff] }
 0x8a5   : > { %v810_v14 = vmul.f32 %v808_v10, %v804_v30 }
 0x8a6   : > { %v1008_v22 = vpop.permute.xlu1 %1007 }
 0x8a7   : > { %v1395_v18 = vpop.eup %1394  ;;  %v815_v19 = vadd.f32 %v813_v17, %v810_v14 }
 0x8a8   : > { %1042 = vperm.xlu0 %1375, %v1395_v18  }
 0x8a9   : > { %817 = vst.msk [vmem:[#allocation4] sm:$0xff] %vm816_vm11, %v815_v19 }
 0x8ac   : > { %1377 = vset.pattern.permute.xlu0 %v1433_v24 }
 0x8b0   : > { %v1004_v21 = vld [vmem:[#allocation4] sm:$0xff] }
 0x8b1   : > { %v1010_v23 = vmul.f32 %v1008_v22, %v1004_v21 }
 0x8d7   : > { %v1000_v6 = vpop.f32.mrb[6].mxu0 }
 0x8d8   : > { %1012 = vrot.lane.b32.xlu1 %v1000_v6, %s1437_s30  ;;  %v1259_v20 = vpop.f32.mrb[7].mxu0 }
 0x8dc   : > { %1028 = vperm.xlu1 %1373, %v1395_v18  }
 0x8e0   : > { %1374 = vset.pattern.permute.xlu1 %v1427_v35 }
 0x8e1   : > { %1035 = vperm.xlu1 %1374, %v1395_v18  }
 0x8e5   : > { %1376 = vset.pattern.permute.xlu1 %v1433_v24 }
 0x8e6   : > { %1049 = vperm.xlu1 %1376, %v1395_v18  }
 0x927   : > { %v1043_v24 = vpop.permute.xlu0 %1042 }
 0x94a   : > { %v1013_v0 = vpop.permute.xlu1 %1012 }
 0x94b   : > { %v1015_v4 = vadd.f32 %v1013_v0, %v1010_v23 }
 0x94d   : > { %1017 = vst.msk [vmem:[#allocation4] sm:$0xff] %vm1016_vm12, %v1015_v4 }
 0x954   : > { %v1025_v25 = vld [vmem:[#allocation4] sm:$0xff] }
 0x95b   : > { %v1029_v26 = vpop.permute.xlu1 %1028 }
 0x95c   : > { %v1031_v27 = vmul.f32 %v1029_v26, %v1025_v25 }
 0x95e   : > { %1032 = vst.msk [vmem:[#allocation4] sm:$0xff] %vm225_vm1, %v1031_v27 }
 0x960   : > { %v1036_v35 = vpop.permute.xlu1 %1035 }
 0x965   : > { %v1033_v29 = vld [vmem:[#allocation4] sm:$0xff]  ;;  %v1050_v12 = vpop.permute.xlu1 %1049 }
 0x966   : > { %v1038_v31 = vmul.f32 %v1036_v35, %v1033_v29 }
 0x968   : > { %1039 = vst.msk [vmem:[#allocation4] sm:$0xff] %vm616_vm10, %v1038_v31 }
 0x96f   : > { %v1040_v32 = vld [vmem:[#allocation4] sm:$0xff] }
 0x970   : > { %v1045_v33 = vmul.f32 %v1043_v24, %v1040_v32 }
 0x972   : > { %1046 = vst.msk [vmem:[#allocation4] sm:$0xff] %vm816_vm11, %v1045_v33 }
 0x979   : > { %v1047_v34 = vld [vmem:[#allocation4] sm:$0xff] }
 0x97a   : > { %v1052_v28 = vmul.f32 %v1050_v12, %v1047_v34 }
 0x97c   : > { %1053 = vst.msk [vmem:[#allocation4] sm:$0xff] %vm1016_vm12, %v1052_v28 }
 0x983   : > { %v1054_v36 = vld [vmem:[#allocation4] sm:$0xff] }
 0x984   : > { %1056 = vst.msk [vmem:[%s212_s5] sm:$0xff] %vm220_vm9, %v1054_v36 }
 0x985 PF: > { %s12_s11 = sadd.s32 1, %s1418_s11   ;;  %s1657_s9 = smov %s1414_s10 }
 0x986   : > { %p9_p5 = scmp.ge.s32.totalorder %s12_s11, 4   ;;  %s1658_s10 = smov %s1660_s12 }
 0x988   :  { %11 = sbr.rel (!%p9_p5) target bundleno = 2 (0x2), region = 69 }

</bundles_post_ra>
